<compile_context>
chip_gen: v7x
topology: tpu7x:2x2x1
jax: 0.10.0
libtpu: 0.0.40
codegen_flags: <defaults>
</compile_context>

<pallas_src>
import math

import jax
import jax.numpy as jnp
from jax.experimental import pallas as pl
from jax.experimental.pallas import tpu as pltpu


OUT_FEATS = 16  # DenseNet head width, reshaped to (N, 4, 4)


# ---------------------------------------------------------------------------
# Kernel
# ---------------------------------------------------------------------------
def _affine_head_kernel(wc_ref, x1_ref, x2_ref, w1_ref, b1_ref, w2_ref, b2_ref,
                        o_ref, acc_ref):
    k = pl.program_id(1)

    @pl.when(k == 0)
    def _():
        acc_ref[...] = jnp.zeros_like(acc_ref)

    # 1x1x1 conv over the two concatenated channels == per-channel scale + add (VPU).
    y = (wc_ref[0] * x1_ref[...].astype(jnp.float32)
         + wc_ref[1] * x2_ref[...].astype(jnp.float32))
    # Partial fc1 contraction over this K tile (MXU, f32 accumulation).
    acc_ref[...] += jnp.dot(y, w1_ref[...].astype(jnp.float32),
                            preferred_element_type=jnp.float32)

    @pl.when(k == pl.num_programs(1) - 1)
    def _():
        h = jnp.maximum(acc_ref[...] + b1_ref[...], 0.0)           # (+ folded conv bias), ReLU
        out = jnp.dot(h, w2_ref[...], preferred_element_type=jnp.float32) + b2_ref[...]
        o_ref[...] = jnp.tanh(out)                                  # (tn, 16)


# ---------------------------------------------------------------------------
# Tiling / VMEM budgeting
# ---------------------------------------------------------------------------
def _round_up(x, m):
    return ((x + m - 1) // m) * m


def _vmem_capacity_bytes():
    try:
        cap = int(pltpu.get_tpu_info().vmem_capacity_bytes)
        if cap > 0:
            return cap
    except Exception:
        pass
    return 64 * 1024 * 1024            # v7x floor: conservative default everywhere


def _num_tensorcores():
    try:
        info = pltpu.get_tpu_info()
        for attr in ("num_cores", "core_count", "num_tensorcores"):
            v = getattr(info, attr, None)
            if v:
                return int(v)
    except Exception:
        pass
    return 1                           # v5e/v6e behaviour; safe fallback on v7x too


def _pick_k_tile(s, max_elems):
    """Largest multiple-of-128 divisor of S that is <= max_elems.

    Only exact K tiles are used so out-of-bounds padding can never leak into the
    accumulator. Falls back to tk = S when S is not 128-aligned (single K step)."""
    if s % 128 != 0:
        return s
    cap = max(128, (min(s, max_elems) // 128) * 128)
    best = 128
    for tk in range(128, cap + 1, 128):
        if s % tk == 0:
            best = tk
    return best


def _choose_tiles(n, s, x_itemsize, w_itemsize):
    """Pick (tn, tk, vmem_limit_bytes) from padding-aware VMEM accounting."""
    cap = _vmem_capacity_bytes()
    # Bytes allowed for the (padded, multi-buffered) data blocks; leaves headroom for
    # compiler scratch. v7x: 64 MiB physical; v5e/v6e: 128 MiB.
    tile_budget = max(16 * 1024 * 1024, min(int(cap * 0.45), 56 * 1024 * 1024))
    # (tk, 16) weight blocks are lane-padded to (tk, 128) in VMEM (8x raw bytes) and
    # double-buffered; also cap tk so each step's x slab stays moderate.
    max_k_elems = min(4096, max(128, (tile_budget // 8) // (128 * w_itemsize)))
    tk = _pick_k_tile(s, max_k_elems)

    w_bytes = 2 * tk * 128 * w_itemsize                 # double-buffered, lane-padded W1 tile
    const_bytes = 6 * 8 * 128 * 4                       # b1 / w2 / b2 padded + double-buffered
    sub = 8 if x_itemsize >= 4 else 16                  # sublane pack: f32 -> 8, bf16 -> 16
    per_row = 2 * 2 * tk * x_itemsize + 3 * 128 * 4     # x1+x2 (double-buffered) + acc/out rows
    avail = max(tile_budget - w_bytes - const_bytes, per_row * sub)
    tn_cap = int(min(512, max(sub, avail // per_row)))

    if n <= tn_cap:
        tn = n                                          # block dim == full dim is always legal
    else:
        tn = max(sub, (tn_cap // sub) * sub)            # multiple of 8 => legal block dim

    # v7x megacore: give each TensorCore its own batch tile when the batch is big
    # enough; on 1-TC chips (v5e/v6e) keep the single bigger tile (the K axis already
    # provides >= 2 pipelined steps per batch tile for realistic volumes).
    ncores = _num_tensorcores()
    if ncores > 1 and tn == n and n >= 2 * sub:
        tn = max(sub, _round_up(-(-n // ncores), sub))

    needed = w_bytes + const_bytes + per_row * _round_up(tn, sub)
    vmem_limit = int(min(cap * 3 // 4, max(32 * 1024 * 1024, needed * 2)))
    return tn, tk, vmem_limit


# ---------------------------------------------------------------------------
# Host-side weight prep (hoisted: run once per model, not per forward call)
# ---------------------------------------------------------------------------
def prepare_affine_params(conv_w, conv_b, fc1_w, fc1_b, fc2_w, fc2_b,
                          compute_dtype=jnp.bfloat16):
    c = conv_w.shape[1]
    f = fc1_w.shape[0]
    assert c == 2, "AffineGenerator3D concatenates exactly two single-channel volumes"
    assert f == OUT_FEATS and fc2_w.shape == (f, f), "head must emit 16 features for view(-1,4,4)"
    f32 = jnp.float32
    wc = conv_w.reshape(c).astype(f32)                   # (2,) conv scales -> SMEM scalar prefetch
    w1_f32 = fc1_w.astype(f32).T                         # (S, 16), x @ W layout
    # Fold the conv bias into fc1's bias (exact: ReLU comes after the summed bias).
    b1 = (fc1_b.astype(f32)
          + conv_b.reshape(()).astype(f32) * jnp.sum(w1_f32, axis=0)).reshape(1, f)
    w1 = w1_f32.astype(compute_dtype)                    # stream W1 in the activation dtype
    w2 = fc2_w.astype(f32).T
    b2 = fc2_b.astype(f32).reshape(1, f)
    return {"wc": wc, "w1": w1, "b1": b1, "w2": w2, "b2": b2}


# ---------------------------------------------------------------------------
# Forward
# ---------------------------------------------------------------------------
def affine_generator_3d(x1, x2, params):
    """Pallas forward of AffineGenerator3D.forward(x1, x2) -> (N, 4, 4) float32."""
    assert x1.ndim == 5 and x1.shape == x2.shape
    assert x1.shape[1] == 1 and x2.shape[1] == 1, \
        "module concatenates two single-channel 3D volumes"
    n = x1.shape[0]
    s = math.prod(x1.shape[2:])
    f = OUT_FEATS

    wc, w1, b1, w2, b2 = (params["wc"], params["w1"], params["b1"],
                          params["w2"], params["b2"])
    assert w1.shape == (s, f)

    # Channel dim is 1, so the flatten is free and matches torch's cat+flatten layout.
    x1f = x1.reshape(n, s)
    x2f = x2.reshape(n, s)

    tn, tk, vmem_limit = _choose_tiles(n, s, x1f.dtype.itemsize, w1.dtype.itemsize)
    assert s % tk == 0, "K tile must divide S exactly"
    grid = (pl.cdiv(n, tn), s // tk)

    grid_spec = pltpu.PrefetchScalarGridSpec(
        num_scalar_prefetch=1,                                    # wc -> SMEM
        grid=grid,
        in_specs=[
            pl.BlockSpec((tn, tk), lambda i, k, *_: (i, k)),      # x1 rows x K tile
            pl.BlockSpec((tn, tk), lambda i, k, *_: (i, k)),      # x2 rows x K tile
            pl.BlockSpec((tk, f), lambda i, k, *_: (k, 0)),       # W1 K tile
            pl.BlockSpec((1, f), lambda i, k, *_: (0, 0)),        # b1 (conv bias folded in)
            pl.BlockSpec((f, f), lambda i, k, *_: (0, 0)),        # W2
            pl.BlockSpec((1, f), lambda i, k, *_: (0, 0)),        # b2
        ],
        out_specs=pl.BlockSpec((tn, f), lambda i, k, *_: (i, 0)),
        scratch_shapes=[pltpu.VMEM((tn, f), jnp.float32)],        # fc1 accumulator
    )

    flat = pl.pallas_call(
        _affine_head_kernel,
        out_shape=jax.ShapeDtypeStruct((n, f), jnp.float32),
        grid_spec=grid_spec,
        compiler_params=pltpu.CompilerParams(
            dimension_semantics=("parallel", "arbitrary"),
            vmem_limit_bytes=vmem_limit,
        ),
    )(wc, x1f, x2f, w1, b1, w2, b2)

    return flat.reshape(n, 4, 4)


# ---------------------------------------------------------------------------
# Reference + demo
# ---------------------------------------------------------------------------
def _reference(x1, x2, conv_w, conv_b, fc1_w, fc1_b, fc2_w, fc2_b):
    """Straightforward f32 reference of the module forward."""
    n = x1.shape[0]
    x = jnp.concatenate([x1, x2], axis=1).astype(jnp.float32)     # (N, 2, D, H, W)
    c = x.shape[1]
    xf = x.reshape(n, c, -1)
    wc = conv_w.reshape(c).astype(jnp.float32)
    y = jnp.einsum("ncs,c->ns", xf, wc) + conv_b.reshape(()).astype(jnp.float32)
    h = jnp.maximum(y @ fc1_w.astype(jnp.float32).T + fc1_b.astype(jnp.float32), 0.0)
    out = jnp.tanh(h @ fc2_w.astype(jnp.float32).T + fc2_b.astype(jnp.float32))
    return out.reshape(n, 4, 4)


if __name__ == "__main__":
    # Small, module-consistent shapes: batch=2, two single-channel 3D volumes of
    # 16x16x32 voxels -> S = 8192, which gives 2 K-tiles (tk = 4096) so the grid-level
    # accumulation path is actually exercised by this run.
    N, D, H, W = 2, 16, 16, 32
    S = D * H * W

    key = jax.random.PRNGKey(0)
    k1, k2, kcw, kcb, kw1, kb1, kw2, kb2 = jax.random.split(key, 8)

    # Activations kept in bf16 (halves HBM traffic of the memory-bound kernel).
    x1 = jax.random.normal(k1, (N, 1, D, H, W), dtype=jnp.float32).astype(jnp.bfloat16)
    x2 = jax.random.normal(k2, (N, 1, D, H, W), dtype=jnp.float32).astype(jnp.bfloat16)

    # Deterministic synthetic parameters in PyTorch layouts.
    conv_w = jax.random.normal(kcw, (1, 2, 1, 1, 1), dtype=jnp.float32) * 0.1   # Conv3d(2,1,1)
    conv_b = jax.random.normal(kcb, (1,), dtype=jnp.float32) * 0.1
    fc1_w = jax.random.normal(kw1, (OUT_FEATS, S), dtype=jnp.float32) * 0.05    # Linear(S,16)
    fc1_b = jax.random.normal(kb1, (OUT_FEATS,), dtype=jnp.float32) * 0.05
    fc2_w = jax.random.normal(kw2, (OUT_FEATS, OUT_FEATS), dtype=jnp.float32) * 0.1
    fc2_b = jax.random.normal(kb2, (OUT_FEATS,), dtype=jnp.float32) * 0.1

    # Weight prep hoisted out of the forward path (done once per model).
    params = prepare_affine_params(conv_w, conv_b, fc1_w, fc1_b, fc2_w, fc2_b,
                                   compute_dtype=x1.dtype)

    out = affine_generator_3d(x1, x2, params)
    out = jax.block_until_ready(out)

    ref = _reference(x1, x2, conv_w, conv_b, fc1_w, fc1_b, fc2_w, fc2_b)
    assert out.shape == (N, 4, 4)
    err = float(jnp.max(jnp.abs(out - ref)))
    # bf16-streamed W1/x vs pure-f32 reference -> loose but bug-catching tolerance.
    assert jnp.allclose(out, ref, atol=1e-2, rtol=1e-2), err

    print("KERNEL_OK")
</pallas_src>

<mosaic_0001>
module attributes {stable_mosaic.version = 11 : i64} {
  func.func @_affine_head_kernel(%arg0: i32, %arg1: i32, %arg2: memref<2xf32, #tpu.memory_space<smem>>, %arg3: memref<2x4096xbf16, #tpu.memory_space<vmem>>, %arg4: memref<2x4096xbf16, #tpu.memory_space<vmem>>, %arg5: memref<4096x16xbf16, #tpu.memory_space<vmem>>, %arg6: memref<1x16xf32, #tpu.memory_space<vmem>>, %arg7: memref<16x16xf32, #tpu.memory_space<vmem>>, %arg8: memref<1x16xf32, #tpu.memory_space<vmem>>, %arg9: memref<2x16xf32, #tpu.memory_space<vmem>>, %arg10: memref<2x16xf32, #tpu.memory_space<vmem>>) attributes {dimension_semantics = [#tpu.dimension_semantics<parallel>, #tpu.dimension_semantics<arbitrary>], iteration_bounds = array<i64: 1, 2>, scalar_prefetch = 1 : i64, scratch_operands = 1 : i64, tpu.core_type = #tpu.core_type<tc>, window_params = [{transform_indices = @transform_0, window_bounds = array<i64: 2, 4096>}, {transform_indices = @transform_1, window_bounds = array<i64: 2, 4096>}, {transform_indices = @transform_2, window_bounds = array<i64: 4096, 16>}, {pipeline_mode = #tpu.pipeline_mode<synchronous>, transform_indices = @transform_3, window_bounds = array<i64: 1, 16>}, {pipeline_mode = #tpu.pipeline_mode<synchronous>, transform_indices = @transform_4, window_bounds = array<i64: 16, 16>}, {pipeline_mode = #tpu.pipeline_mode<synchronous>, transform_indices = @transform_5, window_bounds = array<i64: 1, 16>}, {transform_indices = @transform_6, window_bounds = array<i64: 2, 16>}]} {
    %c0_i32 = arith.constant 0 : i32
    %0 = arith.cmpi eq, %arg1, %c0_i32 : i32
    %1 = arith.extui %0 : i1 to i32
    %c0_i32_0 = arith.constant 0 : i32
    %2 = arith.cmpi ne, %1, %c0_i32_0 : i32
    scf.if %2 {
      %cst_12 = arith.constant 0.000000e+00 : f32
      %23 = vector.broadcast %cst_12 : f32 to vector<2x16xf32>
      %c0_13 = arith.constant 0 : index
      %c0_14 = arith.constant 0 : index
      %24 = vector.load %arg10[%c0_13, %c0_14] : memref<2x16xf32, #tpu.memory_space<vmem>>, vector<2x16xf32>
      tpu.vector_store %arg10[%c0_13, %c0_14], %23 {strides = array<i32>} : memref<2x16xf32, #tpu.memory_space<vmem>>, vector<2x16xf32>,
    } else {
    }
    %c0 = arith.constant 0 : index
    %3 = memref.load %arg2[%c0] : memref<2xf32, #tpu.memory_space<smem>>
    %c0_1 = arith.constant 0 : index
    %c0_2 = arith.constant 0 : index
    %4 = vector.load %arg3[%c0_1, %c0_2] : memref<2x4096xbf16, #tpu.memory_space<vmem>>, vector<2x4096xbf16>
    %5 = arith.extf %4 : vector<2x4096xbf16> to vector<2x4096xf32>
    %6 = vector.broadcast %3 : f32 to vector<2x4096xf32>
    %7 = arith.mulf %6, %5 : vector<2x4096xf32>
    %c1 = arith.constant 1 : index
    %8 = memref.load %arg2[%c1] : memref<2xf32, #tpu.memory_space<smem>>
    %c0_3 = arith.constant 0 : index
    %c0_4 = arith.constant 0 : index
    %9 = vector.load %arg4[%c0_3, %c0_4] : memref<2x4096xbf16, #tpu.memory_space<vmem>>, vector<2x4096xbf16>
    %10 = arith.extf %9 : vector<2x4096xbf16> to vector<2x4096xf32>
    %11 = vector.broadcast %8 : f32 to vector<2x4096xf32>
    %12 = arith.mulf %11, %10 : vector<2x4096xf32>
    %13 = arith.addf %7, %12 : vector<2x4096xf32>
    %c0_5 = arith.constant 0 : index
    %c0_6 = arith.constant 0 : index
    %14 = vector.load %arg10[%c0_5, %c0_6] : memref<2x16xf32, #tpu.memory_space<vmem>>, vector<2x16xf32>
    %c0_7 = arith.constant 0 : index
    %c0_8 = arith.constant 0 : index
    %15 = vector.load %arg5[%c0_7, %c0_8] : memref<4096x16xbf16, #tpu.memory_space<vmem>>, vector<4096x16xbf16>
    %16 = arith.extf %15 : vector<4096x16xbf16> to vector<4096x16xf32>
    %cst = arith.constant dense<0.000000e+00> : vector<2x16xf32>
    %17 = tpu.matmul %13, %16, %cst {dimension_numbers = #tpu.dot_dimension_numbers<[1], [0], [0], [1], [0, 0, 1, 1], [], []>} : vector<2x4096xf32>, vector<4096x16xf32>, vector<2x16xf32> -> vector<2x16xf32>
    %18 = arith.addf %14, %17 : vector<2x16xf32>
    %c0_9 = arith.constant 0 : index
    %c0_10 = arith.constant 0 : index
    %19 = vector.load %arg10[%c0_9, %c0_10] : memref<2x16xf32, #tpu.memory_space<vmem>>, vector<2x16xf32>
    tpu.vector_store %arg10[%c0_9, %c0_10], %18 {strides = array<i32>} : memref<2x16xf32, #tpu.memory_space<vmem>>, vector<2x16xf32>,
    %c1_i32 = arith.constant 1 : i32
    %20 = arith.cmpi eq, %arg1, %c1_i32 : i32
    %21 = arith.extui %20 : i1 to i32
    %c0_i32_11 = arith.constant 0 : i32
    %22 = arith.cmpi ne, %21, %c0_i32_11 : i32
    scf.if %22 {
      %c0_12 = arith.constant 0 : index
      %c0_13 = arith.constant 0 : index
      %23 = vector.load %arg10[%c0_12, %c0_13] : memref<2x16xf32, #tpu.memory_space<vmem>>, vector<2x16xf32>
      %c0_14 = arith.constant 0 : index
      %c0_15 = arith.constant 0 : index
      %24 = vector.load %arg6[%c0_14, %c0_15] : memref<1x16xf32, #tpu.memory_space<vmem>>, vector<1x16xf32>
      %25 = vector.broadcast %24 : vector<1x16xf32> to vector<2x16xf32>
      %26 = arith.addf %23, %25 : vector<2x16xf32>
      %cst_16 = arith.constant 0.000000e+00 : f32
      %27 = vector.broadcast %cst_16 : f32 to vector<2x16xf32>
      %28 = arith.maximumf %26, %27 : vector<2x16xf32>
      %c0_17 = arith.constant 0 : index
      %c0_18 = arith.constant 0 : index
      %29 = vector.load %arg7[%c0_17, %c0_18] : memref<16x16xf32, #tpu.memory_space<vmem>>, vector<16x16xf32>
      %cst_19 = arith.constant dense<0.000000e+00> : vector<2x16xf32>
      %30 = tpu.matmul %28, %29, %cst_19 {dimension_numbers = #tpu.dot_dimension_numbers<[1], [0], [0], [1], [0, 0, 1, 1], [], []>} : vector<2x16xf32>, vector<16x16xf32>, vector<2x16xf32> -> vector<2x16xf32>
      %c0_20 = arith.constant 0 : index
      %c0_21 = arith.constant 0 : index
      %31 = vector.load %arg8[%c0_20, %c0_21] : memref<1x16xf32, #tpu.memory_space<vmem>>, vector<1x16xf32>
      %32 = vector.broadcast %31 : vector<1x16xf32> to vector<2x16xf32>
      %33 = arith.addf %30, %32 : vector<2x16xf32>
      %34 = math.tanh %33 : vector<2x16xf32>
      %c0_22 = arith.constant 0 : index
      %c0_23 = arith.constant 0 : index
      %35 = vector.load %arg9[%c0_22, %c0_23] : memref<2x16xf32, #tpu.memory_space<vmem>>, vector<2x16xf32>
      tpu.vector_store %arg9[%c0_22, %c0_23], %34 {strides = array<i32>} : memref<2x16xf32, #tpu.memory_space<vmem>>, vector<2x16xf32>,
    } else {
    }
    return
  }
  func.func @transform_0(%arg0: i32, %arg1: i32, %arg2: memref<2xf32, #tpu.memory_space<smem>>) -> (i32, i32) {
    %c0_i32 = arith.constant 0 : i32
    return %arg0, %arg1 : i32, i32
  }
  func.func @transform_1(%arg0: i32, %arg1: i32, %arg2: memref<2xf32, #tpu.memory_space<smem>>) -> (i32, i32) {
    %c0_i32 = arith.constant 0 : i32
    return %arg0, %arg1 : i32, i32
  }
  func.func @transform_2(%arg0: i32, %arg1: i32, %arg2: memref<2xf32, #tpu.memory_space<smem>>) -> (i32, i32) {
    %c0_i32 = arith.constant 0 : i32
    %c0_i32_0 = arith.constant 0 : i32
    return %arg1, %c0_i32 : i32, i32
  }
  func.func @transform_3(%arg0: i32, %arg1: i32, %arg2: memref<2xf32, #tpu.memory_space<smem>>) -> (i32, i32) {
    %c0_i32 = arith.constant 0 : i32
    %c0_i32_0 = arith.constant 0 : i32
    %c0_i32_1 = arith.constant 0 : i32
    return %c0_i32, %c0_i32_0 : i32, i32
  }
  func.func @transform_4(%arg0: i32, %arg1: i32, %arg2: memref<2xf32, #tpu.memory_space<smem>>) -> (i32, i32) {
    %c0_i32 = arith.constant 0 : i32
    %c0_i32_0 = arith.constant 0 : i32
    %c0_i32_1 = arith.constant 0 : i32
    return %c0_i32, %c0_i32_0 : i32, i32
  }
  func.func @transform_5(%arg0: i32, %arg1: i32, %arg2: memref<2xf32, #tpu.memory_space<smem>>) -> (i32, i32) {
    %c0_i32 = arith.constant 0 : i32
    %c0_i32_0 = arith.constant 0 : i32
    %c0_i32_1 = arith.constant 0 : i32
    return %c0_i32, %c0_i32_0 : i32, i32
  }
  func.func @transform_6(%arg0: i32, %arg1: i32, %arg2: memref<2xf32, #tpu.memory_space<smem>>) -> (i32, i32) {
    %c0_i32 = arith.constant 0 : i32
    %c0_i32_0 = arith.constant 0 : i32
    return %arg0, %c0_i32 : i32, i32
  }
}

</mosaic_0001>

<bundles_post_ra>
// kernel: tpu_custom_call.1
= control target key start
LH: loop header
LB: loop body
LE: loop exit
PB: predicated region body
PF: predicated region fallthrough
CT: control target
= control target key end

     0   :  { %s5926_s0 = inlined_call_operand.vmem [shape: f32[2], index: 0, kind: input, shape index: {}]   ;;  %s5927_s1 = inlined_call_operand.vmem [shape: bf16[2,8192], index: 1, kind: input, shape index: {}]   ;;  %s5928_s2 = inlined_call_operand.vmem [shape: bf16[2,8192], index: 2, kind: input, shape index: {}]   ;;  %s5929_s3 = inlined_call_operand.vmem [shape: bf16[8192,16], index: 3, kind: input, shape index: {}]   ;;  %s5930_s4 = inlined_call_operand.vmem [shape: f32[1,16], index: 4, kind: input, shape index: {}]   ;;  %s5931_s5 = inlined_call_operand.vmem [shape: f32[16,16], index: 5, kind: input, shape index: {}]   ;;  %s5932_s6 = inlined_call_operand.vmem [shape: f32[1,16], index: 6, kind: input, shape index: {}]   ;;  %s5933_s7 = inlined_call_operand.hbm [shape: f32[2,16], index: 7, kind: output, shape index: {}]  }
   0x1   :  { %s12_s26 = sshll.u32 %s5926_s0, 4  ;;  %s13_s26 = int_to_ptr.vmem [resolvable:$true] %s12_s26 }
   0x2   :  { %s5321_s27 = scalar_lea.vmem %s13_s26, 16  ;;  %p5326_p1 = scmp.lt.s32.totalorder %s13_s26, %s13_s26 }
   0x3   :  { %p5322_p0 = scmp.ne.s32.totalorder %s13_s26, %s5321_s27  ;;  %p5327_p2 = scmp.lt.s32.totalorder %s5321_s27, %s5321_s27 }
   0x5   :  { %p5328_p3 = por %p5327_p2, %p5326_p1 }
   0x7   :  { %p5329_p4 = pnand %p5328_p3, %p5322_p0 }
   0x9   :  { %5332 = shalt.err (!%p5329_p4)  }
   0xa   :  { %s5389_s28 = smov [#allocation4]  }
   0xb   :  { %15 = dma.vmem_to_smem %s13_s26, 16, %s5389_s28, [#allocation3] }
   0xc   :  { %5371 = dma.done.wait [#allocation3], 16 }
   0xd   :  { %5372 = vsyncadd [#allocation3], 4294967280 }
   0xe   :  { %17 = sfence }
   0xf   :  { %18 = vsyncpa [#allocation6], 0  ;;  %s5439_s29 = smov 0   ;;  %s5441_s30 = smov 0  }
  0x10   :  { %s5443_s8 = smov 0  }
  0x11 LB: > { %s2900_s0 = sadd.s32 4294967295, %s5387_s8   ;;  %s33_s9 = sadd.s32 1, %s5383_s30  ;;  %s5387_s8 = sphi %s5443_s8, %s24_s8   ;;  %s5383_s30 = sphi %s5441_s30, %s5936_s30   ;;  %s5379_s29 = sphi %s5439_s29, %s5935_s29  }
  0x12   : > { %p34_p5 = scmp.ge.s32.totalorder %s33_s9, 2  ;;  %p2903_p6 = scmp.ge.s32.totalorder %s5387_s8, 1 }
  0x13   : > { %p265_p7 = scmp.lt.s32.totalorder %s5387_s8, 3 }
  0x14   : > { %s5938_s9 = smov (%p34_p5, %s33_s9), 0 }
  0x15   : > { %p266_p8 = pnand %p2903_p6, %p265_p7 }
  0x16   : > { %s2904_s10 = sshll.u32 (!%p266_p8), %s5379_s29, 5  ;;  %s2906_s11 = sshll.u32 (!%p266_p8), %s5379_s29, 9 }
  0x17   : > { %269 = sbr.rel (%p266_p8) target bundleno = 781 (0x30d), region = 44  ;;  %p309_p9 = scmp.lt.s32.totalorder (!%p266_p8), %s2904_s10, 63 }
  0x18   : > { %p325_p10 = scmp.lt.s32.totalorder (!%p266_p8), %s2906_s11, 1023  ;;  %p2908_p11 = scmp.ne.s32.totalorder (!%p266_p8), %s5379_s29, 0 }
  0x1e   : > { %s5940_s10 = smov (!%p309_p9, %s2904_s10), 63  ;;  %s5942_s11 = smov (!%p325_p10, %s2906_s11), 1023 }
  0x1f   : > { %s5465_s14 = scalar_lea.vmem %s5927_s1, %s5940_s10  ;;  %s5470_s17 = scalar_lea.vmem %s5928_s2, %s5940_s10  ;;  %vm334_vm0 = vcmask (!%p2908_p11), 123904   ;;  %v5390_v0 = vmov (!%p2908_p11), 0.0  }
  0x20   : > { %s2907_s18 = sshll.u32 %s5942_s11, 2  ;;  %333 = sbr.rel (%p2908_p11) target bundleno = 39 (0x27), region = 48  ;;  %335 = vst.msk [vmem:[#allocation2] sm:$0x3] (!%p2908_p11), %vm334_vm0, %v5390_v0 }
  0x21   : > { %s5475_s21 = scalar_lea.vmem %s5929_s3, %s2907_s18 }
  0x27 PF: > { %v3949_v1 = vld [vmem:[%s5475_s21 + $0x40] sm:$0xff]   ;;  %v3950_v5 = vld [vmem:[%s5475_s21 + $0x48] sm:$0xff]   ;;  %s336_s22 = sld [smem:[#allocation4]]  ;;  %s2909_s23 = sld [smem:[#allocation4 + $0x1]]  ;;  %v3951_v9 = vld [vmem:[%s5475_s21 + $0x50] sm:$0xff]   ;;  %v1425_v13 = vlaneseq  ;;  %vm2710_vm1 = vcmask 123904  }
  0x28   : > { %v3965_v2 = vld [vmem:[%s5475_s21 + $0xc0] sm:$0xff]   ;;  %4768 = vmatprep.subr.bf16.mxu0 %v3949_v1  ;;  %v3966_v6 = vld [vmem:[%s5475_s21 + $0xc8] sm:$0xff]   ;;  %v3967_v10 = vld [vmem:[%s5475_s21 + $0xd0] sm:$0xff]   ;;  %v5391_v11 = vmov 1983009808   ;;  %p2910_p12 = scmp.ne.s32.totalorder %s5379_s29, 1 }
  0x29   : > { %v2919_v3 = vld [vmem:[%s5475_s21] sm:$0xff]   ;;  %4800 = vmatprep.subr.bf16.mxu1 %v3965_v2  ;;  %v3942_v7 = vld [vmem:[%s5475_s21 + $0x8] sm:$0xff]   ;;  %v1423_v12 = vunpack.c.l.s4 %v5391_v11  ;;  %v3943_v14 = vld [vmem:[%s5475_s21 + $0x10] sm:$0xff]   ;;  %v1426_v21 = vshrl.u32 %v1425_v13, 7  ;;  %vm5393_vm2 = vmmov (!%p2910_p12), 0   ;;  %vm2735_vm3 = vcmask (!%p2910_p12), 130048  }
  0x2a   : > { %v3957_v4 = vld [vmem:[%s5475_s21 + $0x80] sm:$0xff]   ;;  %4770 = vmatpush3.bf16.msra.mxu0 %v2919_v3  ;;  %v3958_v8 = vld [vmem:[%s5475_s21 + $0x88] sm:$0xff]   ;;  %v3959_v15 = vld [vmem:[%s5475_s21 + $0x90] sm:$0xff]  }
  0x2b   : > { %4802 = vmatpush3.bf16.msra.mxu1 %v3957_v4  ;;  %4772 = vmatprep.subr.bf16.mxu0 %v3950_v5  ;;  %v3952_v16 = vld [vmem:[%s5475_s21 + $0x58] sm:$0xff]   ;;  %v337_v18 = vld [vmem:[%s5465_s14] sm:$0xff]  ;;  %v1424_v20 = vunpack.c.0.s8 %v1423_v12  ;;  %v3954_v37 = vld [vmem:[%s5475_s21 + $0x68] sm:$0xff]  }
  0x2c   : > { %4804 = vmatprep.subr.bf16.mxu1 %v3966_v6  ;;  %v3968_v17 = vld [vmem:[%s5475_s21 + $0xd8] sm:$0xff]   ;;  %v341_v24 = vunpack.c.l.bf16 %v337_v18  ;;  %v359_v25 = vld [vmem:[%s5470_s17] sm:$0xff]  ;;  %v342_v29 = vunpack.c.h.bf16 %v337_v18  ;;  %v3970_v38 = vld [vmem:[%s5475_s21 + $0xe8] sm:$0xff]  }
  0x2d   : > { %v5493_v19 = vstv %s336_s22  ;;  %v3944_v22 = vld [vmem:[%s5475_s21 + $0x18] sm:$0xff]   ;;  %v5498_v26 = vstv %s2909_s23  ;;  %v3953_v27 = vld [vmem:[%s5475_s21 + $0x60] sm:$0xff]   ;;  %v363_v30 = vunpack.c.l.bf16 %v359_v25  ;;  %v364_v31 = vunpack.c.h.bf16 %v359_v25 }
  0x2e   : > { %4774 = vmatpush3.bf16.msra.mxu0 %v3942_v7  ;;  %v3960_v23 = vld [vmem:[%s5475_s21 + $0x98] sm:$0xff]   ;;  %v3969_v28 = vld [vmem:[%s5475_s21 + $0xe0] sm:$0xff]   ;;  %v350_v32 = vmul.f32 %v5493_v19, %v341_v24  ;;  %v5504_v34 = vsub.s32 %v1424_v20, %v1426_v21  ;;  %v351_v40 = vmul.f32 %v5493_v19, %v342_v29  ;;  %v3946_v44 = vld [vmem:[%s5475_s21 + $0x28] sm:$0xff]  }
  0x2f   : > { %4806 = vmatpush3.bf16.msra.mxu1 %v3958_v8  ;;  %4776 = vmatprep.subr.bf16.mxu0 %v3951_v9  ;;  %v372_v33 = vmul.f32 %v5498_v26, %v363_v30  ;;  %v3945_v35 = vld [vmem:[%s5475_s21 + $0x20] sm:$0xff]   ;;  %v373_v41 = vmul.f32 %v5498_v26, %v364_v31  ;;  %v3962_v45 = vld [vmem:[%s5475_s21 + $0xa8] sm:$0xff]   ;;  %v3955_v46 = vld [vmem:[%s5475_s21 + $0x70] sm:$0xff]  }
  0x30   : > { %4808 = vmatprep.subr.bf16.mxu1 %v3967_v10  ;;  %v3961_v36 = vld [vmem:[%s5475_s21 + $0xa0] sm:$0xff]   ;;  %v3971_v47 = vld [vmem:[%s5475_s21 + $0xf0] sm:$0xff]   ;;  %v3956_v54 = vld [vmem:[%s5475_s21 + $0x78] sm:$0xff]  }
  0x31   : > { %v380_v39 = vadd.f32 %v372_v33, %v350_v32  ;;  %v381_v50 = vadd.f32 %v373_v41, %v351_v40  ;;  %v3947_v52 = vld [vmem:[%s5475_s21 + $0x30] sm:$0xff]   ;;  %v3972_v55 = vld [vmem:[%s5475_s21 + $0xf8] sm:$0xff]   ;;  %v3981_v59 = vld [vmem:[%s5475_s21 + $0x140] sm:$0xff]  }
  0x32   : > { %4778 = vmatpush3.bf16.msra.mxu0 %v3943_v14  ;;  %v3963_v53 = vld [vmem:[%s5475_s21 + $0xb0] sm:$0xff]   ;;  %v3948_v57 = vld [vmem:[%s5475_s21 + $0x38] sm:$0xff]   ;;  %v3997_v60 = vld [vmem:[%s5475_s21 + $0x1c0] sm:$0xff]  }
  0x33   : > { %4810 = vmatpush3.bf16.msra.mxu1 %v3959_v15  ;;  %4780 = vmatprep.subr.bf16.mxu0 %v3952_v16  ;;  %v1428_v42 = vrot.slane %v380_v39, %v5504_v34  ;;  %v1421_v43 = vcombine.high %v380_v39, %v380_v39  ;;  %v1438_v56 = vcombine.high %v381_v50, %v381_v50  ;;  %v3964_v58 = vld [vmem:[%s5475_s21 + $0xb8] sm:$0xff]   ;;  %v3973_v63 = vld [vmem:[%s5475_s21 + $0x100] sm:$0xff]   ;;  %v3982_v1 = vld [vmem:[%s5475_s21 + $0x148] sm:$0xff]  }
  0x34   : > { %4812 = vmatprep.subr.bf16.mxu1 %v3968_v17  ;;  %v5527_v61 = vrot.slane %v381_v50, %v5504_v34  ;;  %v3989_v0 = vld [vmem:[%s5475_s21 + $0x180] sm:$0xff]   ;;  %v3998_v2 = vld [vmem:[%s5475_s21 + $0x1c8] sm:$0xff]   ;;  %v3983_v7 = vld [vmem:[%s5475_s21 + $0x150] sm:$0xff]  }
  0x35   : > { %v1436_v48 = vcombine.high %v1428_v42, %v1428_v42  ;;  %v1435_v49 = vrot.slane %v1421_v43, %v5504_v34  ;;  %v5530_v62 = vrot.slane %v1438_v56, %v5504_v34  ;;  %v3974_v5 = vld [vmem:[%s5475_s21 + $0x108] sm:$0xff]   ;;  %v3999_v8 = vld [vmem:[%s5475_s21 + $0x1d0] sm:$0xff]   ;;  %v3984_v11 = vld [vmem:[%s5475_s21 + $0x158] sm:$0xff]  }
  0x36   : > { %4782 = vmatpush3.bf16.msra.mxu0 %v3944_v22  ;;  %v1453_v3 = vcombine.high %v5527_v61, %v5527_v61  ;;  %v3990_v6 = vld [vmem:[%s5475_s21 + $0x188] sm:$0xff]   ;;  %v3975_v9 = vld [vmem:[%s5475_s21 + $0x110] sm:$0xff]   ;;  %v4000_v12 = vld [vmem:[%s5475_s21 + $0x1d8] sm:$0xff]  }
  0x37   : > { %4814 = vmatpush3.bf16.msra.mxu1 %v3960_v23  ;;  %4784 = vmatprep.subr.bf16.mxu0 %v3953_v27  ;;  %v1437_v51 = vcombine.high %v1435_v49, %v1435_v49  ;;  %v1454_v4 = vcombine.high %v5530_v62, %v5530_v62  ;;  %v3991_v10 = vld [vmem:[%s5475_s21 + $0x190] sm:$0xff]   ;;  %v5549_v13 = vld [vmem:[%s5465_s14 + $0x8] sm:$0xff]  ;;  %v3976_v15 = vld [vmem:[%s5475_s21 + $0x118] sm:$0xff]  }
  0x38   : > { %4816 = vmatprep.subr.bf16.mxu1 %v3969_v28  ;;  %1653 = vmatprep.mubr.f32.mxu0 %v1436_v48  ;;  %v5552_v14 = vld [vmem:[%s5470_s17 + $0x8] sm:$0xff]  ;;  %v3992_v16 = vld [vmem:[%s5475_s21 + $0x198] sm:$0xff]   ;;  %v3985_v17 = vld [vmem:[%s5475_s21 + $0x160] sm:$0xff]   ;;  %v343_v20 = vunpack.c.l.bf16 %v5549_v13 }
  0x39   : > { %1723 = vmatprep.mubr.f32.mxu1 %v1437_v51  ;;  %v4001_v18 = vld [vmem:[%s5475_s21 + $0x1e0] sm:$0xff]   ;;  %v365_v21 = vunpack.c.l.bf16 %v5552_v14  ;;  %v3986_v24 = vld [vmem:[%s5475_s21 + $0x168] sm:$0xff]   ;;  %v3987_v31 = vld [vmem:[%s5475_s21 + $0x170] sm:$0xff]  }
  0x3a   : > { %4786 = vmatpush3.bf16.msra.mxu0 %v3945_v35  ;;  %v3977_v22 = vld [vmem:[%s5475_s21 + $0x120] sm:$0xff]   ;;  %v4002_v25 = vld [vmem:[%s5475_s21 + $0x1e8] sm:$0xff]   ;;  %v352_v27 = vmul.f32 %v5493_v19, %v343_v20  ;;  %v4003_v32 = vld [vmem:[%s5475_s21 + $0x1f0] sm:$0xff]  }
  0x3b   : > { %4818 = vmatpush3.bf16.msra.mxu1 %v3961_v36  ;;  %4788 = vmatprep.subr.bf16.mxu0 %v3954_v37  ;;  %v3993_v23 = vld [vmem:[%s5475_s21 + $0x1a0] sm:$0xff]   ;;  %v374_v28 = vmul.f32 %v5498_v26, %v365_v21  ;;  %v3978_v29 = vld [vmem:[%s5475_s21 + $0x128] sm:$0xff]   ;;  %v3979_v35 = vld [vmem:[%s5475_s21 + $0x130] sm:$0xff]  }
  0x3c   : > { %4820 = vmatprep.subr.bf16.mxu1 %v3970_v38  ;;  %v3994_v30 = vld [vmem:[%s5475_s21 + $0x1a8] sm:$0xff]   ;;  %v3995_v36 = vld [vmem:[%s5475_s21 + $0x1b0] sm:$0xff]   ;;  %v3988_v37 = vld [vmem:[%s5475_s21 + $0x178] sm:$0xff]  }
  0x3d   : > { %v382_v33 = vadd.f32 %v374_v28, %v352_v27  ;;  %v4004_v38 = vld [vmem:[%s5475_s21 + $0x1f8] sm:$0xff]   ;;  %v4029_v43 = vld [vmem:[%s5475_s21 + $0x2c0] sm:$0xff]   ;;  %v4014_v48 = vld [vmem:[%s5475_s21 + $0x248] sm:$0xff]  }
  0x3e   : > { %4790 = vmatpush3.bf16.msra.mxu0 %v3946_v44  ;;  %v3980_v40 = vld [vmem:[%s5475_s21 + $0x138] sm:$0xff]   ;;  %v4007_v56 = vld [vmem:[%s5475_s21 + $0x210] sm:$0xff]   ;;  %v4045_v21 = vld [vmem:[%s5475_s21 + $0x340] sm:$0xff]  }
  0x3f   : > { %4822 = vmatpush3.bf16.msra.mxu1 %v3962_v45  ;;  %4792 = vmatprep.subr.bf16.mxu0 %v3955_v46  ;;  %v1455_v39 = vcombine.high %v382_v33, %v382_v33  ;;  %v3996_v41 = vld [vmem:[%s5475_s21 + $0x1b8] sm:$0xff]   ;;  %v5579_v44 = vrot.slane %v382_v33, %v5504_v34  ;;  %v4005_v46 = vld [vmem:[%s5475_s21 + $0x200] sm:$0xff]   ;;  %v4046_v28 = vld [vmem:[%s5475_s21 + $0x348] sm:$0xff]  }
  0x40   : > { %4824 = vmatprep.subr.bf16.mxu1 %v3971_v47  ;;  %v4021_v47 = vld [vmem:[%s5475_s21 + $0x280] sm:$0xff]   ;;  %v4028_v20 = vld [vmem:[%s5475_s21 + $0x2b8] sm:$0xff]   ;;  %v4054_v33 = vld [vmem:[%s5475_s21 + $0x388] sm:$0xff]  }
  0x41   : > { %v5582_v45 = vrot.slane %v1455_v39, %v5504_v34  ;;  %v1470_v50 = vcombine.high %v5579_v44, %v5579_v44  ;;  %v4053_v27 = vld [vmem:[%s5475_s21 + $0x380] sm:$0xff]   ;;  %v4048_v39 = vld [vmem:[%s5475_s21 + $0x358] sm:$0xff]  }
  0x42   : > { %4794 = vmatpush3.bf16.msra.mxu0 %v3947_v52  ;;  %v4006_v52 = vld [vmem:[%s5475_s21 + $0x208] sm:$0xff]  }
  0x43   : > { %4826 = vmatpush3.bf16.msra.mxu1 %v3963_v53  ;;  %4796 = vmatprep.subr.bf16.mxu0 %v3956_v54  ;;  %v1471_v51 = vcombine.high %v5582_v45, %v5582_v45  ;;  %v4022_v53 = vld [vmem:[%s5475_s21 + $0x288] sm:$0xff]   ;;  %v4015_v54 = vld [vmem:[%s5475_s21 + $0x250] sm:$0xff]  }
  0x44   : > { %4828 = vmatprep.subr.bf16.mxu1 %v3972_v55  ;;  %v4031_v55 = vld [vmem:[%s5475_s21 + $0x2d0] sm:$0xff]  }
  0x46   : > { %4798 = vmatpush3.bf16.msra.mxu0 %v3948_v57  ;;  %v4023_v57 = vld [vmem:[%s5475_s21 + $0x290] sm:$0xff]  }
  0x47   : > { %4830 = vmatpush3.bf16.msra.mxu1 %v3964_v58  ;;  %4832 = vmatprep.subr.bf16.mxu0 %v3981_v59  ;;  %v4016_v58 = vld [vmem:[%s5475_s21 + $0x258] sm:$0xff]  }
  0x48   : > { %4864 = vmatprep.subr.bf16.mxu1 %v3997_v60  ;;  %v4032_v59 = vld [vmem:[%s5475_s21 + $0x2d8] sm:$0xff]  }
  0x49   : > { %1654 = vmatmul.mubr.f32.vlgmr.msra.gmra.mrb[0].mxu0 %v1428_v42  ;;  %v4013_v42 = vld [vmem:[%s5475_s21 + $0x240] sm:$0xff]   ;;  %v4008_v60 = vld [vmem:[%s5475_s21 + $0x218] sm:$0xff]  }
  0x4a   : > { %1724 = vmatmul.mubr.f32.vlgmr.msra.gmra.mrb[0].mxu1 %v1435_v49  ;;  %4834 = vmatpush3.bf16.msra.mxu0 %v3973_v63  ;;  %v4030_v49 = vld [vmem:[%s5475_s21 + $0x2c8] sm:$0xff]   ;;  %v4033_v63 = vld [vmem:[%s5475_s21 + $0x2e0] sm:$0xff]  }
  0x4b   : > { %4866 = vmatpush3.bf16.msra.mxu1 %v3989_v0  ;;  %4836 = vmatprep.subr.bf16.mxu0 %v3982_v1  ;;  %v344_v0 = vunpack.c.h.bf16 %v5549_v13  ;;  %v366_v1 = vunpack.c.h.bf16 %v5552_v14  ;;  %v4011_v13 = vld [vmem:[%s5475_s21 + $0x230] sm:$0xff]  }
  0x4c   : > { %4868 = vmatprep.subr.bf16.mxu1 %v3998_v2  ;;  %1793 = vmatprep.mubr.f32.mxu0 %v1453_v3  ;;  %v4009_v2 = vld [vmem:[%s5475_s21 + $0x220] sm:$0xff]   ;;  %v4027_v14 = vld [vmem:[%s5475_s21 + $0x2b0] sm:$0xff]  }
  0x4d   : > { %1863 = vmatprep.mubr.f32.mxu1 %v1454_v4  ;;  %v4025_v3 = vld [vmem:[%s5475_s21 + $0x2a0] sm:$0xff]   ;;  %v4018_v4 = vld [vmem:[%s5475_s21 + $0x268] sm:$0xff]  }
  0x4e   : > { %4838 = vmatpush3.bf16.msra.mxu0 %v3974_v5  ;;  %v4034_v5 = vld [vmem:[%s5475_s21 + $0x2e8] sm:$0xff]  }
  0x4f   : > { %4870 = vmatpush3.bf16.msra.mxu1 %v3990_v6  ;;  %4840 = vmatprep.subr.bf16.mxu0 %v3983_v7  ;;  %v353_v6 = vmul.f32 %v5493_v19, %v344_v0  ;;  %v375_v7 = vmul.f32 %v5498_v26, %v366_v1  ;;  %v4044_v1 = vld [vmem:[%s5475_s21 + $0x338] sm:$0xff]  }
  0x50   : > { %4872 = vmatprep.subr.bf16.mxu1 %v3999_v8  ;;  %v4010_v8 = vld [vmem:[%s5475_s21 + $0x228] sm:$0xff]  }
  0x52   : > { %4842 = vmatpush3.bf16.msra.mxu0 %v3975_v9  ;;  %v4026_v9 = vld [vmem:[%s5475_s21 + $0x2a8] sm:$0xff]  }
  0x53   : > { %4874 = vmatpush3.bf16.msra.mxu1 %v3991_v10  ;;  %4844 = vmatprep.subr.bf16.mxu0 %v3984_v11  ;;  %v4019_v10 = vld [vmem:[%s5475_s21 + $0x270] sm:$0xff]  }
  0x54   : > { %4876 = vmatprep.subr.bf16.mxu1 %v4000_v12  ;;  %v4035_v11 = vld [vmem:[%s5475_s21 + $0x2f0] sm:$0xff]   ;;  %v383_v12 = vadd.f32 %v375_v7, %v353_v6  ;;  %v4069_v7 = vld [vmem:[%s5475_s21 + $0x400] sm:$0xff]  }
  0x56   : > { %4846 = vmatpush3.bf16.msra.mxu0 %v3976_v15  ;;  %v4020_v15 = vld [vmem:[%s5475_s21 + $0x278] sm:$0xff]  }
  0x57   : > { %4878 = vmatpush3.bf16.msra.mxu1 %v3992_v16  ;;  %4848 = vmatprep.subr.bf16.mxu0 %v3985_v17  ;;  %v4036_v16 = vld [vmem:[%s5475_s21 + $0x2f8] sm:$0xff]   ;;  %v1472_v17 = vcombine.high %v383_v12, %v383_v12 }
  0x58   : > { %4880 = vmatprep.subr.bf16.mxu1 %v4001_v18  ;;  %v4012_v18 = vld [vmem:[%s5475_s21 + $0x238] sm:$0xff]  }
  0x5a   : > { %4850 = vmatpush3.bf16.msra.mxu0 %v3977_v22  ;;  %v4061_v22 = vld [vmem:[%s5475_s21 + $0x3c0] sm:$0xff]  }
  0x5b   : > { %4882 = vmatpush3.bf16.msra.mxu1 %v3993_v23  ;;  %4852 = vmatprep.subr.bf16.mxu0 %v3986_v24  ;;  %v5627_v23 = vrot.slane %v383_v12, %v5504_v34  ;;  %v5630_v24 = vrot.slane %v1472_v17, %v5504_v34  ;;  %v4071_v17 = vld [vmem:[%s5475_s21 + $0x410] sm:$0xff]  }
  0x5c   : > { %4884 = vmatprep.subr.bf16.mxu1 %v4002_v25  ;;  %v4037_v25 = vld [vmem:[%s5475_s21 + $0x300] sm:$0xff]  }
  0x5e   : > { %4854 = vmatpush3.bf16.msra.mxu0 %v3978_v29  ;;  %v4062_v29 = vld [vmem:[%s5475_s21 + $0x3c8] sm:$0xff]  }
  0x5f   : > { %4886 = vmatpush3.bf16.msra.mxu1 %v3994_v30  ;;  %4856 = vmatprep.subr.bf16.mxu0 %v3987_v31  ;;  %v1487_v30 = vcombine.high %v5627_v23, %v5627_v23  ;;  %v1488_v31 = vcombine.high %v5630_v24, %v5630_v24 }
  0x60   : > { %4888 = vmatprep.subr.bf16.mxu1 %v4003_v32  ;;  %v4038_v32 = vld [vmem:[%s5475_s21 + $0x308] sm:$0xff]  }
  0x62   : > { %4858 = vmatpush3.bf16.msra.mxu0 %v3979_v35  ;;  %v4047_v35 = vld [vmem:[%s5475_s21 + $0x350] sm:$0xff]  }
  0x63   : > { %4890 = vmatpush3.bf16.msra.mxu1 %v3995_v36  ;;  %4860 = vmatprep.subr.bf16.mxu0 %v3988_v37  ;;  %v4063_v36 = vld [vmem:[%s5475_s21 + $0x3d0] sm:$0xff]  }
  0x64   : > { %4892 = vmatprep.subr.bf16.mxu1 %v4004_v38  ;;  %v4039_v37 = vld [vmem:[%s5475_s21 + $0x310] sm:$0xff]  }
  0x65   : > { %v4055_v38 = vld [vmem:[%s5475_s21 + $0x390] sm:$0xff]  }
  0x66   : > { %4862 = vmatpush3.bf16.msra.mxu0 %v3980_v40  ;;  %v4064_v40 = vld [vmem:[%s5475_s21 + $0x3d8] sm:$0xff]  }
  0x67   : > { %4894 = vmatpush3.bf16.msra.mxu1 %v3996_v41  ;;  %4896 = vmatprep.subr.bf16.mxu0 %v4013_v42  ;;  %v5651_v41 = vld [vmem:[%s5465_s14 + $0x10] sm:$0xff] }
  0x68   : > { %4928 = vmatprep.subr.bf16.mxu1 %v4029_v43  ;;  %v5654_v42 = vld [vmem:[%s5470_s17 + $0x10] sm:$0xff]  ;;  %v4040_v43 = vld [vmem:[%s5475_s21 + $0x318] sm:$0xff]  }
  0x69   : > { %1794 = vmatmul.mubr.f32.vlgmr.msra.gmra.mrb[2].mxu0 %v5527_v61  ;;  %v4024_v61 = vld [vmem:[%s5475_s21 + $0x298] sm:$0xff]  }
  0x6a   : > { %1864 = vmatmul.mubr.f32.vlgmr.msra.gmra.mrb[2].mxu1 %v5530_v62  ;;  %4898 = vmatpush3.bf16.msra.mxu0 %v4005_v46  ;;  %v4017_v62 = vld [vmem:[%s5475_s21 + $0x260] sm:$0xff]  }
  0x6b   : > { %4930 = vmatpush3.bf16.msra.mxu1 %v4021_v47  ;;  %4900 = vmatprep.subr.bf16.mxu0 %v4014_v48  ;;  %v4065_v46 = vld [vmem:[%s5475_s21 + $0x3e0] sm:$0xff]   ;;  %v345_v47 = vunpack.c.l.bf16 %v5651_v41  ;;  %v367_v48 = vunpack.c.l.bf16 %v5654_v42 }
  0x6c   : > { %4932 = vmatprep.subr.bf16.mxu1 %v4030_v49  ;;  %1933 = vmatprep.mubr.f32.mxu0 %v1470_v50  ;;  %v4041_v49 = vld [vmem:[%s5475_s21 + $0x320] sm:$0xff]  }
  0x6d   : > { %2003 = vmatprep.mubr.f32.mxu1 %v1471_v51  ;;  %v4057_v50 = vld [vmem:[%s5475_s21 + $0x3a0] sm:$0xff]   ;;  %v4050_v51 = vld [vmem:[%s5475_s21 + $0x368] sm:$0xff]  }
  0x6e   : > { %4902 = vmatpush3.bf16.msra.mxu0 %v4006_v52  ;;  %v4066_v52 = vld [vmem:[%s5475_s21 + $0x3e8] sm:$0xff]  }
  0x6f   : > { %4934 = vmatpush3.bf16.msra.mxu1 %v4022_v53  ;;  %4904 = vmatprep.subr.bf16.mxu0 %v4015_v54  ;;  %v354_v53 = vmul.f32 %v5493_v19, %v345_v47  ;;  %v376_v54 = vmul.f32 %v5498_v26, %v367_v48  ;;  %v4092_v47 = vld [vmem:[%s5475_s21 + $0x4b8] sm:$0xff]   ;;  %v4109_v48 = vld [vmem:[%s5475_s21 + $0x540] sm:$0xff]  }
  0x70   : > { %4936 = vmatprep.subr.bf16.mxu1 %v4031_v55  ;;  %v4042_v55 = vld [vmem:[%s5475_s21 + $0x328] sm:$0xff]  }
  0x72   : > { %4906 = vmatpush3.bf16.msra.mxu0 %v4007_v56  ;;  %v4058_v56 = vld [vmem:[%s5475_s21 + $0x3a8] sm:$0xff]  }
  0x73   : > { %4938 = vmatpush3.bf16.msra.mxu1 %v4023_v57  ;;  %4908 = vmatprep.subr.bf16.mxu0 %v4016_v58  ;;  %v4051_v57 = vld [vmem:[%s5475_s21 + $0x370] sm:$0xff]  }
  0x74   : > { %4940 = vmatprep.subr.bf16.mxu1 %v4032_v59  ;;  %v4067_v58 = vld [vmem:[%s5475_s21 + $0x3f0] sm:$0xff]   ;;  %v384_v59 = vadd.f32 %v376_v54, %v354_v53  ;;  %v4117_v53 = vld [vmem:[%s5475_s21 + $0x580] sm:$0xff]   ;;  %v4110_v54 = vld [vmem:[%s5475_s21 + $0x548] sm:$0xff]  }
  0x76   : > { %4910 = vmatpush3.bf16.msra.mxu0 %v4008_v60  ;;  %v4043_v60 = vld [vmem:[%s5475_s21 + $0x330] sm:$0xff]   ;;  %v1489_v0 = vcombine.high %v384_v59, %v384_v59 }
  0x77   : > { %4942 = vmatpush3.bf16.msra.mxu1 %v4024_v61  ;;  %4912 = vmatprep.subr.bf16.mxu0 %v4017_v62  ;;  %v4059_v61 = vld [vmem:[%s5475_s21 + $0x3b0] sm:$0xff]   ;;  %v4052_v62 = vld [vmem:[%s5475_s21 + $0x378] sm:$0xff]  }
  0x78   : > { %4944 = vmatprep.subr.bf16.mxu1 %v4033_v63  ;;  %v4068_v63 = vld [vmem:[%s5475_s21 + $0x3f8] sm:$0xff]   ;;  %v5684_v6 = vrot.slane %v1489_v0, %v5504_v34 }
  0x79   : > { %v4112_v0 = vld [vmem:[%s5475_s21 + $0x558] sm:$0xff]  }
  0x7a   : > { %4914 = vmatpush3.bf16.msra.mxu0 %v4009_v2  ;;  %v4060_v2 = vld [vmem:[%s5475_s21 + $0x3b8] sm:$0xff]   ;;  %v1505_v12 = vcombine.high %v5684_v6, %v5684_v6 }
  0x7b   : > { %4946 = vmatpush3.bf16.msra.mxu1 %v4025_v3  ;;  %4916 = vmatprep.subr.bf16.mxu0 %v4018_v4  ;;  %v4077_v3 = vld [vmem:[%s5475_s21 + $0x440] sm:$0xff]  }
  0x7c   : > { %4948 = vmatprep.subr.bf16.mxu1 %v4034_v5  ;;  %v4093_v4 = vld [vmem:[%s5475_s21 + $0x4c0] sm:$0xff]   ;;  %v5681_v5 = vrot.slane %v384_v59, %v5504_v34  ;;  %v4118_v59 = vld [vmem:[%s5475_s21 + $0x588] sm:$0xff]  }
  0x7e   : > { %4918 = vmatpush3.bf16.msra.mxu0 %v4010_v8  ;;  %v4085_v8 = vld [vmem:[%s5475_s21 + $0x480] sm:$0xff]  }
  0x7f   : > { %4950 = vmatpush3.bf16.msra.mxu1 %v4026_v9  ;;  %4920 = vmatprep.subr.bf16.mxu0 %v4019_v10  ;;  %v4078_v9 = vld [vmem:[%s5475_s21 + $0x448] sm:$0xff]  }
  0x80   : > { %4952 = vmatprep.subr.bf16.mxu1 %v4035_v11  ;;  %v4094_v10 = vld [vmem:[%s5475_s21 + $0x4c8] sm:$0xff]   ;;  %v1504_v11 = vcombine.high %v5681_v5, %v5681_v5 }
  0x82   : > { %4922 = vmatpush3.bf16.msra.mxu0 %v4011_v13  ;;  %v4070_v13 = vld [vmem:[%s5475_s21 + $0x408] sm:$0xff]  }
  0x83   : > { %4954 = vmatpush3.bf16.msra.mxu1 %v4027_v14  ;;  %4924 = vmatprep.subr.bf16.mxu0 %v4020_v15  ;;  %v4086_v14 = vld [vmem:[%s5475_s21 + $0x488] sm:$0xff]   ;;  %v4079_v15 = vld [vmem:[%s5475_s21 + $0x450] sm:$0xff]  }
  0x84   : > { %4956 = vmatprep.subr.bf16.mxu1 %v4036_v16  ;;  %v4095_v16 = vld [vmem:[%s5475_s21 + $0x4d0] sm:$0xff]  }
  0x86   : > { %4926 = vmatpush3.bf16.msra.mxu0 %v4012_v18  ;;  %v4087_v18 = vld [vmem:[%s5475_s21 + $0x490] sm:$0xff]  }
  0x87   : > { %4958 = vmatpush3.bf16.msra.mxu1 %v4028_v20  ;;  %4960 = vmatprep.subr.bf16.mxu0 %v4045_v21  ;;  %v4080_v20 = vld [vmem:[%s5475_s21 + $0x458] sm:$0xff]  }
  0x88   : > { %4992 = vmatprep.subr.bf16.mxu1 %v4061_v22  ;;  %v4096_v21 = vld [vmem:[%s5475_s21 + $0x4d8] sm:$0xff]  }
  0x89   : > { %1934 = vmatmul.mubr.f32.vlgmr.msra.gmra.mrb[4].mxu0 %v5579_v44  ;;  %v4056_v44 = vld [vmem:[%s5475_s21 + $0x398] sm:$0xff]  }
  0x8a   : > { %2004 = vmatmul.mubr.f32.vlgmr.msra.gmra.mrb[4].mxu1 %v5582_v45  ;;  %4962 = vmatpush3.bf16.msra.mxu0 %v4037_v25  ;;  %v4049_v45 = vld [vmem:[%s5475_s21 + $0x360] sm:$0xff]   ;;  %v4072_v22 = vld [vmem:[%s5475_s21 + $0x418] sm:$0xff]  }
  0x8b   : > { %4994 = vmatpush3.bf16.msra.mxu1 %v4053_v27  ;;  %4964 = vmatprep.subr.bf16.mxu0 %v4046_v28  ;;  %v4097_v25 = vld [vmem:[%s5475_s21 + $0x4e0] sm:$0xff]   ;;  %v346_v27 = vunpack.c.h.bf16 %v5651_v41  ;;  %v368_v28 = vunpack.c.h.bf16 %v5654_v42  ;;  %v4075_v41 = vld [vmem:[%s5475_s21 + $0x430] sm:$0xff]  }
  0x8c   : > { %4996 = vmatprep.subr.bf16.mxu1 %v4062_v29  ;;  %2073 = vmatprep.mubr.f32.mxu0 %v1487_v30  ;;  %v4073_v29 = vld [vmem:[%s5475_s21 + $0x420] sm:$0xff]   ;;  %v4091_v42 = vld [vmem:[%s5475_s21 + $0x4b0] sm:$0xff]  }
  0x8d   : > { %2143 = vmatprep.mubr.f32.mxu1 %v1488_v31  ;;  %v4089_v30 = vld [vmem:[%s5475_s21 + $0x4a0] sm:$0xff]   ;;  %v4082_v31 = vld [vmem:[%s5475_s21 + $0x468] sm:$0xff]  }
  0x8e   : > { %4966 = vmatpush3.bf16.msra.mxu0 %v4038_v32  ;;  %v4098_v32 = vld [vmem:[%s5475_s21 + $0x4e8] sm:$0xff]  }
  0x8f   : > { %4998 = vmatpush3.bf16.msra.mxu1 %v4054_v33  ;;  %4968 = vmatprep.subr.bf16.mxu0 %v4047_v35  ;;  %v355_v33 = vmul.f32 %v5493_v19, %v346_v27  ;;  %v377_v35 = vmul.f32 %v5498_v26, %v368_v28  ;;  %v4108_v28 = vld [vmem:[%s5475_s21 + $0x538] sm:$0xff]  }
  0x90   : > { %5000 = vmatprep.subr.bf16.mxu1 %v4063_v36  ;;  %v4074_v36 = vld [vmem:[%s5475_s21 + $0x428] sm:$0xff]  }
  0x92   : > { %4970 = vmatpush3.bf16.msra.mxu0 %v4039_v37  ;;  %v4090_v37 = vld [vmem:[%s5475_s21 + $0x4a8] sm:$0xff]  }
  0x93   : > { %5002 = vmatpush3.bf16.msra.mxu1 %v4055_v38  ;;  %4972 = vmatprep.subr.bf16.mxu0 %v4048_v39  ;;  %v4083_v38 = vld [vmem:[%s5475_s21 + $0x470] sm:$0xff]  }
  0x94   : > { %5004 = vmatprep.subr.bf16.mxu1 %v4064_v40  ;;  %v4099_v39 = vld [vmem:[%s5475_s21 + $0x4f0] sm:$0xff]   ;;  %v385_v40 = vadd.f32 %v377_v35, %v355_v33  ;;  %v4133_v35 = vld [vmem:[%s5475_s21 + $0x600] sm:$0xff]  }
  0x96   : > { %4974 = vmatpush3.bf16.msra.mxu0 %v4040_v43  ;;  %v4084_v43 = vld [vmem:[%s5475_s21 + $0x478] sm:$0xff]  }
  0x97   : > { %5006 = vmatpush3.bf16.msra.mxu1 %v4056_v44  ;;  %4976 = vmatprep.subr.bf16.mxu0 %v4049_v45  ;;  %v4100_v44 = vld [vmem:[%s5475_s21 + $0x4f8] sm:$0xff]   ;;  %v1506_v45 = vcombine.high %v385_v40, %v385_v40 }
  0x98   : > { %5008 = vmatprep.subr.bf16.mxu1 %v4065_v46  ;;  %v4076_v46 = vld [vmem:[%s5475_s21 + $0x438] sm:$0xff]  }
  0x9a   : > { %4978 = vmatpush3.bf16.msra.mxu0 %v4041_v49  ;;  %v4125_v49 = vld [vmem:[%s5475_s21 + $0x5c0] sm:$0xff]  }
  0x9b   : > { %5010 = vmatpush3.bf16.msra.mxu1 %v4057_v50  ;;  %4980 = vmatprep.subr.bf16.mxu0 %v4050_v51  ;;  %v5729_v50 = vrot.slane %v385_v40, %v5504_v34  ;;  %v5732_v51 = vrot.slane %v1506_v45, %v5504_v34  ;;  %v4135_v45 = vld [vmem:[%s5475_s21 + $0x610] sm:$0xff]  }
  0x9c   : > { %5012 = vmatprep.subr.bf16.mxu1 %v4066_v52  ;;  %v4101_v52 = vld [vmem:[%s5475_s21 + $0x500] sm:$0xff]  }
  0x9e   : > { %4982 = vmatpush3.bf16.msra.mxu0 %v4042_v55  ;;  %v4126_v55 = vld [vmem:[%s5475_s21 + $0x5c8] sm:$0xff]  }
  0x9f   : > { %5014 = vmatpush3.bf16.msra.mxu1 %v4058_v56  ;;  %4984 = vmatprep.subr.bf16.mxu0 %v4051_v57  ;;  %v1521_v56 = vcombine.high %v5729_v50, %v5729_v50  ;;  %v1522_v57 = vcombine.high %v5732_v51, %v5732_v51 }
  0xa0   : > { %5016 = vmatprep.subr.bf16.mxu1 %v4067_v58  ;;  %v4102_v58 = vld [vmem:[%s5475_s21 + $0x508] sm:$0xff]  }
  0xa2   : > { %4986 = vmatpush3.bf16.msra.mxu0 %v4043_v60  ;;  %v4111_v60 = vld [vmem:[%s5475_s21 + $0x550] sm:$0xff]  }
  0xa3   : > { %5018 = vmatpush3.bf16.msra.mxu1 %v4059_v61  ;;  %4988 = vmatprep.subr.bf16.mxu0 %v4052_v62  ;;  %v4127_v61 = vld [vmem:[%s5475_s21 + $0x5d0] sm:$0xff]  }
  0xa4   : > { %5020 = vmatprep.subr.bf16.mxu1 %v4068_v63  ;;  %v4103_v62 = vld [vmem:[%s5475_s21 + $0x510] sm:$0xff]  }
  0xa5   : > { %v4119_v63 = vld [vmem:[%s5475_s21 + $0x590] sm:$0xff]  }
  0xa6   : > { %4990 = vmatpush3.bf16.msra.mxu0 %v4044_v1  ;;  %v4128_v1 = vld [vmem:[%s5475_s21 + $0x5d8] sm:$0xff]  }
  0xa7   : > { %5022 = vmatpush3.bf16.msra.mxu1 %v4060_v2  ;;  %5024 = vmatprep.subr.bf16.mxu0 %v4077_v3  ;;  %v5753_v2 = vld [vmem:[%s5465_s14 + $0x18] sm:$0xff] }
  0xa8   : > { %5056 = vmatprep.subr.bf16.mxu1 %v4093_v4  ;;  %v5756_v3 = vld [vmem:[%s5470_s17 + $0x18] sm:$0xff] }
  0xa9   : > { %2074 = vmatmul.mubr.f32.vlgmr.msra.gmra.mrb[6].mxu0 %v5627_v23  ;;  %v4088_v23 = vld [vmem:[%s5475_s21 + $0x498] sm:$0xff]  }
  0xaa   : > { %2144 = vmatmul.mubr.f32.vlgmr.msra.gmra.mrb[6].mxu1 %v5630_v24  ;;  %5026 = vmatpush3.bf16.msra.mxu0 %v4069_v7  ;;  %v4081_v24 = vld [vmem:[%s5475_s21 + $0x460] sm:$0xff]   ;;  %v4104_v4 = vld [vmem:[%s5475_s21 + $0x518] sm:$0xff]  }
  0xab   : > { %5058 = vmatpush3.bf16.msra.mxu1 %v4085_v8  ;;  %5028 = vmatprep.subr.bf16.mxu0 %v4078_v9  ;;  %v4129_v7 = vld [vmem:[%s5475_s21 + $0x5e0] sm:$0xff]   ;;  %v347_v8 = vunpack.c.l.bf16 %v5753_v2  ;;  %v369_v9 = vunpack.c.l.bf16 %v5756_v3 }
  0xac   : > { %5060 = vmatprep.subr.bf16.mxu1 %v4094_v10  ;;  %2213 = vmatprep.mubr.f32.mxu0 %v1504_v11  ;;  %v4105_v10 = vld [vmem:[%s5475_s21 + $0x520] sm:$0xff]  }
  0xad   : > { %2283 = vmatprep.mubr.f32.mxu1 %v1505_v12  ;;  %v4121_v11 = vld [vmem:[%s5475_s21 + $0x5a0] sm:$0xff]   ;;  %v4114_v12 = vld [vmem:[%s5475_s21 + $0x568] sm:$0xff]  }
  0xae   : > { %5030 = vmatpush3.bf16.msra.mxu0 %v4070_v13  ;;  %v4130_v13 = vld [vmem:[%s5475_s21 + $0x5e8] sm:$0xff]  }
  0xaf   : > { %5062 = vmatpush3.bf16.msra.mxu1 %v4086_v14  ;;  %5032 = vmatprep.subr.bf16.mxu0 %v4079_v15  ;;  %v356_v14 = vmul.f32 %v5493_v19, %v347_v8  ;;  %v378_v15 = vmul.f32 %v5498_v26, %v369_v9  ;;  %v4189_v8 = vld [vmem:[%s5475_s21 + $0x7c0] sm:$0xff]  }
  0xb0   : > { %5064 = vmatprep.subr.bf16.mxu1 %v4095_v16  ;;  %v4106_v16 = vld [vmem:[%s5475_s21 + $0x528] sm:$0xff]  }
  0xb2   : > { %5034 = vmatpush3.bf16.msra.mxu0 %v4071_v17  ;;  %v4122_v17 = vld [vmem:[%s5475_s21 + $0x5a8] sm:$0xff]  }
  0xb3   : > { %5066 = vmatpush3.bf16.msra.mxu1 %v4087_v18  ;;  %5036 = vmatprep.subr.bf16.mxu0 %v4080_v20  ;;  %v4115_v18 = vld [vmem:[%s5475_s21 + $0x570] sm:$0xff]  }
  0xb4   : > { %5068 = vmatprep.subr.bf16.mxu1 %v4096_v21  ;;  %v4131_v20 = vld [vmem:[%s5475_s21 + $0x5f0] sm:$0xff]   ;;  %v386_v21 = vadd.f32 %v378_v15, %v356_v14  ;;  %v4190_v14 = vld [vmem:[%s5475_s21 + $0x7c8] sm:$0xff]  }
  0xb6   : > { %5038 = vmatpush3.bf16.msra.mxu0 %v4072_v22  ;;  %v4107_v22 = vld [vmem:[%s5475_s21 + $0x530] sm:$0xff]   ;;  %v1523_v27 = vcombine.high %v386_v21, %v386_v21 }
  0xb7   : > { %5070 = vmatpush3.bf16.msra.mxu1 %v4088_v23  ;;  %5040 = vmatprep.subr.bf16.mxu0 %v4081_v24  ;;  %v4123_v23 = vld [vmem:[%s5475_s21 + $0x5b0] sm:$0xff]   ;;  %v4116_v24 = vld [vmem:[%s5475_s21 + $0x578] sm:$0xff]  }
  0xb8   : > { %5072 = vmatprep.subr.bf16.mxu1 %v4097_v25  ;;  %v4132_v25 = vld [vmem:[%s5475_s21 + $0x5f8] sm:$0xff]   ;;  %v5786_v33 = vrot.slane %v1523_v27, %v5504_v34 }
  0xb9   : > { %v4184_v27 = vld [vmem:[%s5475_s21 + $0x798] sm:$0xff]  }
  0xba   : > { %5042 = vmatpush3.bf16.msra.mxu0 %v4073_v29  ;;  %v4124_v29 = vld [vmem:[%s5475_s21 + $0x5b8] sm:$0xff]   ;;  %v1539_v40 = vcombine.high %v5786_v33, %v5786_v33 }
  0xbb   : > { %5074 = vmatpush3.bf16.msra.mxu1 %v4089_v30  ;;  %5044 = vmatprep.subr.bf16.mxu0 %v4082_v31  ;;  %v4141_v30 = vld [vmem:[%s5475_s21 + $0x640] sm:$0xff]  }
  0xbc   : > { %5076 = vmatprep.subr.bf16.mxu1 %v4098_v32  ;;  %v4157_v31 = vld [vmem:[%s5475_s21 + $0x6c0] sm:$0xff]   ;;  %v5783_v32 = vrot.slane %v386_v21, %v5504_v34  ;;  %v4167_v21 = vld [vmem:[%s5475_s21 + $0x710] sm:$0xff]  }
  0xbe   : > { %5046 = vmatpush3.bf16.msra.mxu0 %v4074_v36  ;;  %v4149_v36 = vld [vmem:[%s5475_s21 + $0x680] sm:$0xff]  }
  0xbf   : > { %5078 = vmatpush3.bf16.msra.mxu1 %v4090_v37  ;;  %5048 = vmatprep.subr.bf16.mxu0 %v4083_v38  ;;  %v4142_v37 = vld [vmem:[%s5475_s21 + $0x648] sm:$0xff]  }
  0xc0   : > { %5080 = vmatprep.subr.bf16.mxu1 %v4099_v39  ;;  %v4158_v38 = vld [vmem:[%s5475_s21 + $0x6c8] sm:$0xff]   ;;  %v1538_v39 = vcombine.high %v5783_v32, %v5783_v32 }
  0xc2   : > { %5050 = vmatpush3.bf16.msra.mxu0 %v4075_v41  ;;  %v4134_v41 = vld [vmem:[%s5475_s21 + $0x608] sm:$0xff]  }
  0xc3   : > { %5082 = vmatpush3.bf16.msra.mxu1 %v4091_v42  ;;  %5052 = vmatprep.subr.bf16.mxu0 %v4084_v43  ;;  %v4150_v42 = vld [vmem:[%s5475_s21 + $0x688] sm:$0xff]   ;;  %v4143_v43 = vld [vmem:[%s5475_s21 + $0x650] sm:$0xff]  }
  0xc4   : > { %5084 = vmatprep.subr.bf16.mxu1 %v4100_v44  ;;  %v4159_v44 = vld [vmem:[%s5475_s21 + $0x6d0] sm:$0xff]  }
  0xc6   : > { %5054 = vmatpush3.bf16.msra.mxu0 %v4076_v46  ;;  %v4151_v46 = vld [vmem:[%s5475_s21 + $0x690] sm:$0xff]  }
  0xc7   : > { %5086 = vmatpush3.bf16.msra.mxu1 %v4092_v47  ;;  %5088 = vmatprep.subr.bf16.mxu0 %v4109_v48  ;;  %v4144_v47 = vld [vmem:[%s5475_s21 + $0x658] sm:$0xff]  }
  0xc8   : > { %5120 = vmatprep.subr.bf16.mxu1 %v4125_v49  ;;  %v4160_v48 = vld [vmem:[%s5475_s21 + $0x6d8] sm:$0xff]  }
  0xc9   : > { %2214 = vmatmul.mubr.f32.vlgmr.msra.gmra.mrb[8].mxu0 %v5681_v5  ;;  %v4120_v5 = vld [vmem:[%s5475_s21 + $0x598] sm:$0xff]  }
  0xca   : > { %2284 = vmatmul.mubr.f32.vlgmr.msra.gmra.mrb[8].mxu1 %v5684_v6  ;;  %5090 = vmatpush3.bf16.msra.mxu0 %v4101_v52  ;;  %v4113_v6 = vld [vmem:[%s5475_s21 + $0x560] sm:$0xff]   ;;  %v4136_v49 = vld [vmem:[%s5475_s21 + $0x618] sm:$0xff]  }
  0xcb   : > { %5122 = vmatpush3.bf16.msra.mxu1 %v4117_v53  ;;  %5092 = vmatprep.subr.bf16.mxu0 %v4110_v54  ;;  %v4161_v52 = vld [vmem:[%s5475_s21 + $0x6e0] sm:$0xff]   ;;  %v348_v53 = vunpack.c.h.bf16 %v5753_v2  ;;  %v370_v54 = vunpack.c.h.bf16 %v5756_v3  ;;  %v4148_v2 = vld [vmem:[%s5475_s21 + $0x678] sm:$0xff]  }
  0xcc   : > { %5124 = vmatprep.subr.bf16.mxu1 %v4126_v55  ;;  %2353 = vmatprep.mubr.f32.mxu0 %v1521_v56  ;;  %v4137_v55 = vld [vmem:[%s5475_s21 + $0x620] sm:$0xff]   ;;  %v4164_v3 = vld [vmem:[%s5475_s21 + $0x6f8] sm:$0xff]  }
  0xcd   : > { %2423 = vmatprep.mubr.f32.mxu1 %v1522_v57  ;;  %v4153_v56 = vld [vmem:[%s5475_s21 + $0x6a0] sm:$0xff]   ;;  %v4146_v57 = vld [vmem:[%s5475_s21 + $0x668] sm:$0xff]  }
  0xce   : > { %5094 = vmatpush3.bf16.msra.mxu0 %v4102_v58  ;;  %v4162_v58 = vld [vmem:[%s5475_s21 + $0x6e8] sm:$0xff]  }
  0xcf   : > { %5126 = vmatpush3.bf16.msra.mxu1 %v4118_v59  ;;  %5096 = vmatprep.subr.bf16.mxu0 %v4111_v60  ;;  %v357_v59 = vmul.f32 %v5493_v19, %v348_v53  ;;  %v379_v60 = vmul.f32 %v5498_v26, %v370_v54  ;;  %v4139_v19 = vld [vmem:[%s5475_s21 + $0x630] sm:$0xff]  }
  0xd0   : > { %5128 = vmatprep.subr.bf16.mxu1 %v4127_v61  ;;  %v4138_v61 = vld [vmem:[%s5475_s21 + $0x628] sm:$0xff]   ;;  %v4155_v26 = vld [vmem:[%s5475_s21 + $0x6b0] sm:$0xff]  }
  0xd2   : > { %5098 = vmatpush3.bf16.msra.mxu0 %v4103_v62  ;;  %v4154_v62 = vld [vmem:[%s5475_s21 + $0x6a8] sm:$0xff]  }
  0xd3   : > { %5130 = vmatpush3.bf16.msra.mxu1 %v4119_v63  ;;  %5100 = vmatprep.subr.bf16.mxu0 %v4112_v0  ;;  %v4147_v63 = vld [vmem:[%s5475_s21 + $0x670] sm:$0xff]  }
  0xd4   : > { %5132 = vmatprep.subr.bf16.mxu1 %v4128_v1  ;;  %v4163_v0 = vld [vmem:[%s5475_s21 + $0x6f0] sm:$0xff]   ;;  %v387_v1 = vadd.f32 %v379_v60, %v357_v59 }
  0xd6   : > { %5102 = vmatpush3.bf16.msra.mxu0 %v4104_v4  ;;  %v1540_v4 = vcombine.high %v387_v1, %v387_v1  ;;  %v5831_v9 = vrot.slane %v387_v1, %v5504_v34 }
  0xd7   : > { %5134 = vmatpush3.bf16.msra.mxu1 %v4120_v5  ;;  %5104 = vmatprep.subr.bf16.mxu0 %v4113_v6  ;;  %v4140_v5 = vld [vmem:[%s5475_s21 + $0x638] sm:$0xff]  }
  0xd8   : > { %5136 = vmatprep.subr.bf16.mxu1 %v4129_v7  ;;  %v4156_v6 = vld [vmem:[%s5475_s21 + $0x6b8] sm:$0xff]   ;;  %v4173_v7 = vld [vmem:[%s5475_s21 + $0x740] sm:$0xff]   ;;  %v1555_v15 = vcombine.high %v5831_v9, %v5831_v9 }
  0xda   : > { %5106 = vmatpush3.bf16.msra.mxu0 %v4105_v10  ;;  %v5834_v10 = vrot.slane %v1540_v4, %v5504_v34  ;;  %v4166_v34 = vld [vmem:[%s5475_s21 + $0x708] sm:$0xff]  }
  0xdb   : > { %5138 = vmatpush3.bf16.msra.mxu1 %v4121_v11  ;;  %5108 = vmatprep.subr.bf16.mxu0 %v4114_v12  ;;  %v4165_v11 = vld [vmem:[%s5475_s21 + $0x700] sm:$0xff]  }
  0xdc   : > { %5140 = vmatprep.subr.bf16.mxu1 %v4130_v13  ;;  %v4181_v12 = vld [vmem:[%s5475_s21 + $0x780] sm:$0xff]   ;;  %v4174_v13 = vld [vmem:[%s5475_s21 + $0x748] sm:$0xff]  }
  0xde   : > { %5110 = vmatpush3.bf16.msra.mxu0 %v4106_v16  ;;  %v1556_v16 = vcombine.high %v5834_v10, %v5834_v10 }
  0xdf   : > { %5142 = vmatpush3.bf16.msra.mxu1 %v4122_v17  ;;  %5112 = vmatprep.subr.bf16.mxu0 %v4115_v18  ;;  %v4182_v17 = vld [vmem:[%s5475_s21 + $0x788] sm:$0xff]   ;;  %v4175_v18 = vld [vmem:[%s5475_s21 + $0x750] sm:$0xff]  }
  0xe0   : > { %5144 = vmatprep.subr.bf16.mxu1 %v4131_v20  ;;  %v4191_v20 = vld [vmem:[%s5475_s21 + $0x7d0] sm:$0xff]  }
  0xe2   : > { %5114 = vmatpush3.bf16.msra.mxu0 %v4107_v22  ;;  %v4183_v22 = vld [vmem:[%s5475_s21 + $0x790] sm:$0xff]  }
  0xe3   : > { %5146 = vmatpush3.bf16.msra.mxu1 %v4123_v23  ;;  %5116 = vmatprep.subr.bf16.mxu0 %v4116_v24  ;;  %v4176_v23 = vld [vmem:[%s5475_s21 + $0x758] sm:$0xff]  }
  0xe4   : > { %5148 = vmatprep.subr.bf16.mxu1 %v4132_v25  ;;  %v4192_v24 = vld [vmem:[%s5475_s21 + $0x7d8] sm:$0xff]  }
  0xe5   : > { %v4168_v25 = vld [vmem:[%s5475_s21 + $0x718] sm:$0xff]  }
  0xe6   : > { %5118 = vmatpush3.bf16.msra.mxu0 %v4108_v28  ;;  %v4177_v28 = vld [vmem:[%s5475_s21 + $0x760] sm:$0xff]  }
  0xe7   : > { %5150 = vmatpush3.bf16.msra.mxu1 %v4124_v29  ;;  %5152 = vmatprep.subr.bf16.mxu0 %v4141_v30  ;;  %v4193_v29 = vld [vmem:[%s5475_s21 + $0x7e0] sm:$0xff]  }
  0xe8   : > { %5184 = vmatprep.subr.bf16.mxu1 %v4157_v31  ;;  %v4169_v30 = vld [vmem:[%s5475_s21 + $0x720] sm:$0xff]  }
  0xe9   : > { %2354 = vmatmul.mubr.f32.vlgmr.msra.gmra.mrb[10].mxu0 %v5729_v50  ;;  %v4152_v50 = vld [vmem:[%s5475_s21 + $0x698] sm:$0xff]   ;;  %v4185_v31 = vld [vmem:[%s5475_s21 + $0x7a0] sm:$0xff]  }
  0xea   : > { %2424 = vmatmul.mubr.f32.vlgmr.msra.gmra.mrb[10].mxu1 %v5732_v51  ;;  %5154 = vmatpush3.bf16.msra.mxu0 %v4133_v35  ;;  %v4145_v51 = vld [vmem:[%s5475_s21 + $0x660] sm:$0xff]   ;;  %v4170_v35 = vld [vmem:[%s5475_s21 + $0x728] sm:$0xff]  }
  0xeb   : > { %5186 = vmatpush3.bf16.msra.mxu1 %v4149_v36  ;;  %5156 = vmatprep.subr.bf16.mxu0 %v4142_v37  ;;  %v4186_v36 = vld [vmem:[%s5475_s21 + $0x7a8] sm:$0xff]  }
  0xec   : > { %5188 = vmatprep.subr.bf16.mxu1 %v4158_v38  ;;  %2493 = vmatprep.mubr.f32.mxu0 %v1538_v39  ;;  %v4179_v39 = vld [vmem:[%s5475_s21 + $0x770] sm:$0xff]  }
  0xed   : > { %2563 = vmatprep.mubr.f32.mxu1 %v1539_v40  ;;  %v4195_v40 = vld [vmem:[%s5475_s21 + $0x7f0] sm:$0xff]  }
  0xee   : > { %5158 = vmatpush3.bf16.msra.mxu0 %v4134_v41 }
  0xef   : > { %5190 = vmatpush3.bf16.msra.mxu1 %v4150_v42  ;;  %5160 = vmatprep.subr.bf16.mxu0 %v4143_v43 }
  0xf0   : > { %5192 = vmatprep.subr.bf16.mxu1 %v4159_v44 }
  0xf2   : > { %5162 = vmatpush3.bf16.msra.mxu0 %v4135_v45  ;;  %v4171_v45 = vld [vmem:[%s5475_s21 + $0x730] sm:$0xff]  }
  0xf3   : > { %5194 = vmatpush3.bf16.msra.mxu1 %v4151_v46  ;;  %5164 = vmatprep.subr.bf16.mxu0 %v4144_v47  ;;  %v4187_v46 = vld [vmem:[%s5475_s21 + $0x7b0] sm:$0xff]  }
  0xf4   : > { %5196 = vmatprep.subr.bf16.mxu1 %v4160_v48  ;;  %v4180_v48 = vld [vmem:[%s5475_s21 + $0x778] sm:$0xff]  }
  0xf6   : > { %5166 = vmatpush3.bf16.msra.mxu0 %v4136_v49  ;;  %v4196_v49 = vld [vmem:[%s5475_s21 + $0x7f8] sm:$0xff]  }
  0xf7   : > { %5198 = vmatpush3.bf16.msra.mxu1 %v4152_v50  ;;  %5168 = vmatprep.subr.bf16.mxu0 %v4145_v51  ;;  %v4172_v50 = vld [vmem:[%s5475_s21 + $0x738] sm:$0xff]  }
  0xf8   : > { %5200 = vmatprep.subr.bf16.mxu1 %v4161_v52  ;;  %v4188_v51 = vld [vmem:[%s5475_s21 + $0x7b8] sm:$0xff]  }
  0xfa   : > { %5170 = vmatpush3.bf16.msra.mxu0 %v4137_v55 }
  0xfb   : > { %5202 = vmatpush3.bf16.msra.mxu1 %v4153_v56  ;;  %5172 = vmatprep.subr.bf16.mxu0 %v4146_v57 }
  0xfc   : > { %5204 = vmatprep.subr.bf16.mxu1 %v4162_v58 }
  0xfe   : > { %5174 = vmatpush3.bf16.msra.mxu0 %v4138_v61 }
  0xff   : > { %5206 = vmatpush3.bf16.msra.mxu1 %v4154_v62  ;;  %5176 = vmatprep.subr.bf16.mxu0 %v4147_v63 }
 0x100   : > { %5208 = vmatprep.subr.bf16.mxu1 %v4163_v0 }
 0x102   : > { %5178 = vmatpush3.bf16.msra.mxu0 %v4139_v19 }
 0x103   : > { %5210 = vmatpush3.bf16.msra.mxu1 %v4155_v26  ;;  %5180 = vmatprep.subr.bf16.mxu0 %v4148_v2 }
 0x104   : > { %5212 = vmatprep.subr.bf16.mxu1 %v4164_v3 }
 0x106   : > { %5182 = vmatpush3.bf16.msra.mxu0 %v4140_v5 }
 0x107   : > { %5214 = vmatpush3.bf16.msra.mxu1 %v4156_v6  ;;  %5216 = vmatprep.subr.bf16.mxu0 %v4173_v7 }
 0x108   : > { %5248 = vmatprep.subr.bf16.mxu1 %v4189_v8 }
 0x109   : > { %2494 = vmatmul.mubr.f32.vlgmr.msra.gmra.mrb[12].mxu0 %v5783_v32  ;;  %v4178_v32 = vld [vmem:[%s5475_s21 + $0x768] sm:$0xff]  }
 0x10a   : > { %2564 = vmatmul.mubr.f32.vlgmr.msra.gmra.mrb[12].mxu1 %v5786_v33  ;;  %5218 = vmatpush3.bf16.msra.mxu0 %v4165_v11  ;;  %v4194_v33 = vld [vmem:[%s5475_s21 + $0x7e8] sm:$0xff]  }
 0x10b   : > { %5250 = vmatpush3.bf16.msra.mxu1 %v4181_v12  ;;  %5220 = vmatprep.subr.bf16.mxu0 %v4174_v13 }
 0x10c   : > { %5252 = vmatprep.subr.bf16.mxu1 %v4190_v14  ;;  %2633 = vmatprep.mubr.f32.mxu0 %v1555_v15 }
 0x10d   : > { %2703 = vmatprep.mubr.f32.mxu1 %v1556_v16 }
 0x10e   : > { %5222 = vmatpush3.bf16.msra.mxu0 %v4166_v34 }
 0x10f   : > { %5254 = vmatpush3.bf16.msra.mxu1 %v4182_v17  ;;  %5224 = vmatprep.subr.bf16.mxu0 %v4175_v18 }
 0x110   : > { %5256 = vmatprep.subr.bf16.mxu1 %v4191_v20 }
 0x112   : > { %5226 = vmatpush3.bf16.msra.mxu0 %v4167_v21 }
 0x113   : > { %5258 = vmatpush3.bf16.msra.mxu1 %v4183_v22  ;;  %5228 = vmatprep.subr.bf16.mxu0 %v4176_v23 }
 0x114   : > { %5260 = vmatprep.subr.bf16.mxu1 %v4192_v24 }
 0x116   : > { %5230 = vmatpush3.bf16.msra.mxu0 %v4168_v25 }
 0x117   : > { %5262 = vmatpush3.bf16.msra.mxu1 %v4184_v27  ;;  %5232 = vmatprep.subr.bf16.mxu0 %v4177_v28 }
 0x118   : > { %5264 = vmatprep.subr.bf16.mxu1 %v4193_v29 }
 0x11a   : > { %5234 = vmatpush3.bf16.msra.mxu0 %v4169_v30 }
 0x11b   : > { %5266 = vmatpush3.bf16.msra.mxu1 %v4185_v31  ;;  %5236 = vmatprep.subr.bf16.mxu0 %v4178_v32 }
 0x11c   : > { %5268 = vmatprep.subr.bf16.mxu1 %v4194_v33  ;;  %v4229_v37 = vpop.f32.mrb[0].mxu0 }
 0x11d   : > { %v4264_v38 = vpop.f32.mrb[0].mxu1  ;;  %v4230_v41 = vpop.f32.mrb[1].mxu0 }
 0x11e   : > { %v4265_v42 = vpop.f32.mrb[1].mxu1  ;;  %v4231_v43 = vadd.f32 %v4230_v41, %v4229_v37  ;;  %5238 = vmatpush3.bf16.msra.mxu0 %v4170_v35 }
 0x11f   : > { %v4266_v44 = vadd.f32 %v4265_v42, %v4264_v38  ;;  %5270 = vmatpush3.bf16.msra.mxu1 %v4186_v36  ;;  %5240 = vmatprep.subr.bf16.mxu0 %v4179_v39 }
 0x120   : > { %5272 = vmatprep.subr.bf16.mxu1 %v4195_v40 }
 0x121   : > { %v1726_v47 = vadd.f32 %v4266_v44, %v4231_v43  ;;  %v388_v43 = vld [vmem:[#allocation2] sm:$0x3] }
 0x122   : > { %5242 = vmatpush3.bf16.msra.mxu0 %v4171_v45 }
 0x123   : > { %5274 = vmatpush3.bf16.msra.mxu1 %v4187_v46  ;;  %5244 = vmatprep.subr.bf16.mxu0 %v4180_v48  ;;  %v2726_v46 = vld [vmem:[%s5931_s5] sm:$0xff] (!%p2910_p12)  ;;  %v5392_v48 = vmov (!%p2910_p12), 0.0|0.0  }
 0x124   : > { %5276 = vmatprep.subr.bf16.mxu1 %v4196_v49 }
 0x126   : > { %5246 = vmatpush3.bf16.msra.mxu0 %v4172_v50  ;;  %v5394_v50 = vmov (!%p2910_p12), 0.0  }
 0x127   : > { %5278 = vmatpush3.bf16.msra.mxu1 %v4188_v51  ;;  %5279 = vmatprep.subr.bf16.mxu0 (!%p2910_p12), %v5392_v48 }
 0x129   : > { %2634 = vmatmul.mubr.f32.vlgmr.msra.gmra.mrb[14].mxu0 %v5831_v9 }
 0x12a   : > { %2704 = vmatmul.mubr.f32.vlgmr.msra.gmra.mrb[14].mxu1 %v5834_v10  ;;  %4764 = vmatprep.mubr.msk.f32.mxu0 (!%p2910_p12), %vm5393_vm2, %v5394_v50 }
 0x13c   : > { %v4299_v52 = vpop.f32.mrb[2].mxu0 }
 0x13d   : > { %v4334_v53 = vpop.f32.mrb[2].mxu1  ;;  %v4300_v54 = vpop.f32.mrb[3].mxu0 }
 0x13e   : > { %v4335_v55 = vpop.f32.mrb[3].mxu1  ;;  %v4301_v56 = vadd.f32 %v4300_v54, %v4299_v52  ;;  %v2911_v52 = vld [vmem:[%s5930_s4] ss:$0 sm:$0xff] (!%p2910_p12) }
 0x13f   : > { %v4336_v57 = vadd.f32 %v4335_v55, %v4334_v53  ;;  %v2912_v55 = vld [vmem:[%s5932_s6] ss:$0 sm:$0xff] (!%p2910_p12) }
 0x140   : > { %v1796_v58 = vadd.f32 %v4301_v56, %v1726_v47  ;;  %v2727_v47 = vld [vmem:[%s5931_s5 + $0x8] sm:$0xff] (!%p2910_p12) }
 0x141   : > { %v5280_v49 = vpack.c.bf16 (!%p2910_p12), %v2727_v47, %v2726_v46 }
 0x142   : > { %v1866_v59 = vadd.f32 %v4336_v57, %v1796_v58 }
 0x143   : > { %5281 = vmatpush3.bf16.msra.mxu0 (!%p2910_p12), %v5280_v49 }
 0x15c   : > { %v4369_v60 = vpop.f32.mrb[4].mxu0 }
 0x15d   : > { %v4404_v61 = vpop.f32.mrb[4].mxu1  ;;  %v4370_v62 = vpop.f32.mrb[5].mxu0 }
 0x15e   : > { %v4405_v63 = vpop.f32.mrb[5].mxu1  ;;  %v4371_v0 = vadd.f32 %v4370_v62, %v4369_v60 }
 0x15f   : > { %v4406_v1 = vadd.f32 %v4405_v63, %v4404_v61 }
 0x160   : > { %v1936_v19 = vadd.f32 %v4371_v0, %v1866_v59 }
 0x162   : > { %v2006_v26 = vadd.f32 %v4406_v1, %v1936_v19 }
 0x17c   : > { %v4439_v2 = vpop.f32.mrb[6].mxu0 }
 0x17d   : > { %v4474_v3 = vpop.f32.mrb[6].mxu1  ;;  %v4440_v4 = vpop.f32.mrb[7].mxu0 }
 0x17e   : > { %v4475_v5 = vpop.f32.mrb[7].mxu1  ;;  %v4441_v6 = vadd.f32 %v4440_v4, %v4439_v2 }
 0x17f   : > { %v4476_v7 = vadd.f32 %v4475_v5, %v4474_v3 }
 0x180   : > { %v2076_v8 = vadd.f32 %v4441_v6, %v2006_v26 }
 0x182   : > { %v2146_v9 = vadd.f32 %v4476_v7, %v2076_v8 }
 0x19c   : > { %v4509_v10 = vpop.f32.mrb[8].mxu0 }
 0x19d   : > { %v4544_v11 = vpop.f32.mrb[8].mxu1  ;;  %v4510_v12 = vpop.f32.mrb[9].mxu0 }
 0x19e   : > { %v4545_v13 = vpop.f32.mrb[9].mxu1  ;;  %v4511_v14 = vadd.f32 %v4510_v12, %v4509_v10 }
 0x19f   : > { %v4546_v15 = vadd.f32 %v4545_v13, %v4544_v11 }
 0x1a0   : > { %v2216_v16 = vadd.f32 %v4511_v14, %v2146_v9 }
 0x1a2   : > { %v2286_v34 = vadd.f32 %v4546_v15, %v2216_v16 }
 0x1bc   : > { %v4579_v17 = vpop.f32.mrb[10].mxu0 }
 0x1bd   : > { %v4614_v18 = vpop.f32.mrb[10].mxu1  ;;  %v4580_v20 = vpop.f32.mrb[11].mxu0 }
 0x1be   : > { %v4615_v21 = vpop.f32.mrb[11].mxu1  ;;  %v4581_v22 = vadd.f32 %v4580_v20, %v4579_v17 }
 0x1bf   : > { %v4616_v23 = vadd.f32 %v4615_v21, %v4614_v18 }
 0x1c0   : > { %v2356_v24 = vadd.f32 %v4581_v22, %v2286_v34 }
 0x1c2   : > { %v2426_v25 = vadd.f32 %v4616_v23, %v2356_v24 }
 0x1dc   : > { %v4649_v27 = vpop.f32.mrb[12].mxu0 }
 0x1dd   : > { %v4684_v28 = vpop.f32.mrb[12].mxu1  ;;  %v4650_v29 = vpop.f32.mrb[13].mxu0 }
 0x1de   : > { %v4685_v30 = vpop.f32.mrb[13].mxu1  ;;  %v4651_v31 = vadd.f32 %v4650_v29, %v4649_v27 }
 0x1df   : > { %v4686_v32 = vadd.f32 %v4685_v30, %v4684_v28 }
 0x1e0   : > { %v2496_v33 = vadd.f32 %v4651_v31, %v2426_v25 }
 0x1e2   : > { %v2566_v35 = vadd.f32 %v4686_v32, %v2496_v33 }
 0x1fc   : > { %v4719_v36 = vpop.f32.mrb[14].mxu0 }
 0x1fd   : > { %v4754_v37 = vpop.f32.mrb[14].mxu1  ;;  %v4720_v38 = vpop.f32.mrb[15].mxu0 }
 0x1fe   : > { %v4755_v39 = vpop.f32.mrb[15].mxu1  ;;  %v4721_v40 = vadd.f32 %v4720_v38, %v4719_v36 }
 0x1ff   : > { %v4756_v41 = vadd.f32 %v4755_v39, %v4754_v37 }
 0x200   : > { %v2636_v42 = vadd.f32 %v4721_v40, %v2566_v35  ;;  %2715 = sbr.rel (%p2910_p12) target bundleno = 756 (0x2f4), region = 52 }
 0x202   : > { %v2706_v44 = vadd.f32 %v4756_v41, %v2636_v42 }
 0x204   : > { %v2709_v45 = vadd.f32 %v2706_v44, %v388_v43 }
 0x206   : > { %2711 = vst.msk [vmem:[#allocation2] sm:$0x3] %vm2710_vm1, %v2709_v45 }
 0x20d   : > { %v2716_v51 = vld [vmem:[#allocation2] sm:$0x3] }
 0x20e   : > { %v2724_v53 = vadd.f32 %v2911_v52, %v2716_v51 }
 0x210   : > { %v2725_v54 = vmax.f32 %v2724_v53, 0.0 }
 0x212   : > { %4765 = vmatmul.mubr.msk.f32.vlgmr.msra.gmra.mrb[0].mxu0 %vm2735_vm3, %v2725_v54 }
 0x2e5   : > { %v2805_v56 = vpop.f32.mrb[0].mxu0 }
 0x2e6   : > { %v2806_v57 = vadd.f32 %v2912_v55, %v2805_v56  ;;  %v4766_v58 = vpop.f32.mrb[1].mxu0 }
 0x2e8   : > { %5319 = vtanh.f32 %v2806_v57 }
 0x2f2   : > { %v5320_v59 = vpop.eup %5319 }
 0x2f3   : > { %2810 = vst.msk [vmem:[#allocation5] sm:$0x3] %vm2710_vm1, %v5320_v59 }
 0x2f4 PF: > { %p5891_p13 = scmp.eq.s32.totalorder %s2900_s0, 1  ;;  %s5395_s13 = smov [#allocation5]  }
 0x2f5   : > { %s2820_s14 = sshll.u32 %s5395_s13, 4  ;;  %s2821_s14 = int_to_ptr.vmem [resolvable:$true] %s2820_s14 }
 0x2f6   : > { %s5333_s15 = scalar_lea.vmem %s2821_s14, 32  ;;  %p5340_p3 = scmp.lt.s32.totalorder %s2821_s14, %s2821_s14 }
 0x2f7   : > { %p5334_p0 = scmp.ne.s32.totalorder %s2821_s14, %s5333_s15  ;;  %p5341_p4 = scmp.lt.s32.totalorder %s5333_s15, %s5333_s15 }
 0x2f9   : > { %p5335_p1 = pnand %p5334_p0, %p5891_p13  ;;  %p5342_p5 = por %p5341_p4, %p5340_p3 }
 0x2fb   : > { %p5336_p2 = pneg %p5335_p1 }
 0x2fd   : > { %p5343_p6 = pnand %p5342_p5, %p5336_p2 }
 0x2ff   : > { %5346 = shalt.err (!%p5343_p6)
}
 0x300   : > { %s5347_s0 = scalar_lea.hbm %s5933_s7, 32 }
 0x301   : > { %p5348_p7 = scmp.ne.s32.totalorder %s5933_s7, %s5347_s0  ;;  %p5353_p10 = scmp.lt.u32.totalorder %s5347_s0, %s5933_s7 }
 0x303   : > { %p5349_p8 = pnand %p5348_p7, %p5891_p13 }
 0x305   : > { %p5350_p9 = pneg %p5349_p8 }
 0x307   : > { %p5355_p11 = pnand %p5353_p10, %p5350_p9 }
 0x309   : > { %5358 = shalt.err (!%p5355_p11)
}
 0x30a   : > { %5283 = dma.vmem_to_hbm [thread:$0]  (%p5891_p13), %s2821_s14, 32, %s5933_s7, [#allocation6]  }
 0x30b   : > { %5374 = dma.done.wait (%p5891_p13), [#allocation6], 32  }
 0x30c   : > { %5376 = vsyncadd (%p5891_p13), [#allocation6], 4294967264 }
 0x30d PF: > { %s24_s8 = sadd.s32 1, %s5387_s8   ;;  %s5935_s29 = smov %s5383_s30 }
 0x30e   : > { %p21_p12 = scmp.ge.s32.totalorder %s24_s8, 4   ;;  %s5936_s30 = smov %s5938_s9 }
 0x310   :  { %23 = sbr.rel (!%p21_p12) target bundleno = 17 (0x11), region = 86 }
 0x317   :  { %2833 = vsyncpa [#allocation6], 1 }
 0x318   :  { %2835 = vsyncpa [#allocation6 + $0x1], 1 }

</bundles_post_ra>
